<compile_context>
chip_gen: v7x
topology: tpu7x:2x2x1
jax: 0.10.0
libtpu: 0.0.40
codegen_flags: <defaults>
</compile_context>

<pallas_src>
import numpy as np
import jax
import jax.numpy as jnp
from jax import lax
from jax.experimental import pallas as pl
from jax.experimental.pallas import tpu as pltpu


def _round_up(x, m):
    return ((x + m - 1) // m) * m


# ----------------------------------------------------------------------------
# Pallas kernel: single-layer LSTM over k timesteps for one batch tile
# ----------------------------------------------------------------------------
def _lstm_kernel(x_ref, wx_ref, wh_ref, b_ref, h0_ref, out_ref, pre_ref):
    k, bn, E = x_ref.shape
    H = h0_ref.shape[-1]

    # ---- Phase 1: hoisted input projection (off the recurrence path) -------
    # One large-M matmul: (k*bn, E) @ (E, 4H), bias folded in here so nothing
    # gets re-broadcast inside the time loop.  The reshape that merges the
    # (k, bn) leading dims is a layout no-op (last dim unchanged, bn % 8 == 0).
    x2d = x_ref[...].reshape(k * bn, E)
    pre_ref[...] = (
        jnp.dot(x2d, wx_ref[...], preferred_element_type=jnp.float32)
        + b_ref[...]
    )

    wh = wh_ref[...]                               # (H, 4H) bf16, loop-resident
    h0 = h0_ref[...].astype(jnp.float32)

    # ---- Phase 2: serial recurrence, fully unrolled over k ------------------
    # TODO(synk): with the toy H=32 the per-gate slices cut inside a 128-lane
    # vreg; a production-size H (multiple of 128) makes them lane-aligned.
    def step(t, carry):
        h, c = carry
        row = pl.multiple_of(t * bn, bn)
        gates = pre_ref[pl.ds(row, bn), :] + jnp.dot(
            h.astype(jnp.bfloat16), wh, preferred_element_type=jnp.float32
        )
        i = jax.nn.sigmoid(gates[:, 0 * H:1 * H])
        f = jax.nn.sigmoid(gates[:, 1 * H:2 * H])
        g = jnp.tanh(gates[:, 2 * H:3 * H])
        o = jax.nn.sigmoid(gates[:, 3 * H:4 * H])
        c = f * c + i * g
        h = o * jnp.tanh(c)
        out_ref[t] = h.astype(out_ref.dtype)
        return h, c

    # nn.LSTM is called with (h0, c0) = (hidden_states, hidden_states).
    lax.fori_loop(0, k, step, (h0, h0), unroll=True)


def lstm_forward_pallas(x, wx, wh, b, h0, *, block_n=None):
    """x: (k, N, E), wx: (E, 4H), wh: (H, 4H), b: (4H,), h0: (N, H).
    Returns future_preds: (k, N, H) f32 (h_t for every timestep)."""
    k, N, E = x.shape
    H = h0.shape[-1]

    if block_n is None:
        block_n = min(_round_up(N, 8), 128)
    assert block_n % 8 == 0, "batch tile must be a multiple of 8 sublanes"
    n_pad = _round_up(N, block_n)
    if n_pad != N:
        x = jnp.pad(x, ((0, 0), (0, n_pad - N), (0, 0)))
        h0 = jnp.pad(h0, ((0, n_pad - N), (0, 0)))

    # bf16 activations into the kernel: halves the input DMA and feeds the MXU
    # directly; gate math stays f32 inside the kernel.
    x = x.astype(jnp.bfloat16)
    h0 = h0.astype(jnp.float32)
    wx_bf = wx.astype(jnp.bfloat16)
    wh_bf = wh.astype(jnp.bfloat16)
    b2 = b.reshape(1, 4 * H).astype(jnp.float32)

    out = pl.pallas_call(
        _lstm_kernel,
        out_shape=jax.ShapeDtypeStruct((k, n_pad, H), jnp.float32),
        grid_spec=pltpu.PrefetchScalarGridSpec(
            num_scalar_prefetch=0,
            grid=(n_pad // block_n,),                      # batch tiles only
            in_specs=[
                pl.BlockSpec((k, block_n, E), lambda n: (0, n, 0)),
                pl.BlockSpec((E, 4 * H), lambda n: (0, 0)),
                pl.BlockSpec((H, 4 * H), lambda n: (0, 0)),
                pl.BlockSpec((1, 4 * H), lambda n: (0, 0)),
                pl.BlockSpec((block_n, H), lambda n: (n, 0)),
            ],
            out_specs=pl.BlockSpec((k, block_n, H), lambda n: (0, n, 0)),
            scratch_shapes=[
                pltpu.VMEM((k * block_n, 4 * H), jnp.float32),  # hoisted pre-gates
            ],
        ),
        compiler_params=pltpu.CompilerParams(
            # Batch tiles are independent (recurrence is over time only), so
            # the single grid axis is safe to shard across TCs (v7x megacore).
            dimension_semantics=("parallel",),
        ),
    )(x, wx_bf, wh_bf, b2, h0)
    return out[:, :N, :]


# ----------------------------------------------------------------------------
# Glue: index building, masked gathers, parameter init (plain JAX / numpy)
# ----------------------------------------------------------------------------
def orthogonal_init(key, shape):
    """Deterministic (semi-)orthogonal matrix, mimicking nn.init.orthogonal_."""
    a = np.asarray(jax.random.normal(key, shape, dtype=jnp.float32))
    rows, cols = shape
    flat = a if rows >= cols else a.T
    q, r = np.linalg.qr(flat)
    q = q * np.sign(np.diag(r))
    if rows < cols:
        q = q.T
    return jnp.asarray(q[:rows, :cols], dtype=jnp.float32)


def masked_index_select(t, indexer, valids, fill_value=0.0):
    """JAX equivalent of the PyTorch helper (dim=0)."""
    idx_flat = jnp.where(valids, indexer, 0).reshape(-1)
    out = jnp.take(t, idx_flat, axis=0)
    mask = valids.reshape(-1)[:, None]
    out = jnp.where(mask, out, fill_value)
    return out.reshape(indexer.shape + t.shape[1:])


def build_inds(seq_lengths, k, time_subsample, rng):
    """Host-side replica of _build_inds (deterministic RNG)."""
    longest = max(seq_lengths)
    num_seqs_at_step = np.array(
        [sum(1 for L in seq_lengths if L > t) for t in range(longest)], dtype=np.int64
    )
    start_times, seq_offsets, max_valid = [], [], []
    for i, L in enumerate(seq_lengths):
        if time_subsample >= L - 1:
            st = np.arange(1, L, dtype=np.int64)
        else:
            st = rng.permutation(L)[:time_subsample].astype(np.int64)
        start_times.append(st)
        seq_offsets.append(np.full_like(st, i))
        max_valid.append(np.full_like(st, L - 1))
    start_times = np.concatenate(start_times)
    seq_offsets = np.concatenate(seq_offsets)
    max_valid = np.concatenate(max_valid)

    all_times = np.arange(k, dtype=np.int64).reshape(-1, 1) + start_times.reshape(1, -1)
    action_valids = all_times < max_valid.reshape(1, -1)
    target_valids = (all_times + 1) < max_valid.reshape(1, -1)
    all_times = np.where(action_valids, all_times, 0)

    time_start_inds = np.cumsum(num_seqs_at_step) - num_seqs_at_step
    action_inds = time_start_inds[all_times] + seq_offsets.reshape(1, -1)
    target_inds = time_start_inds[all_times + 1] + seq_offsets.reshape(1, -1)

    select_inds = np.arange(int(sum(seq_lengths)), dtype=np.int64)  # identity packing
    action_inds = select_inds[action_inds]
    target_inds = select_inds[target_inds]
    return (
        jnp.asarray(action_inds), jnp.asarray(target_inds),
        jnp.asarray(action_valids), jnp.asarray(target_valids),
    )


def action_conditioned_forward(rnn_output, action_ids, params, cfg, rng):
    """Reproduces ActionConditionedForwardModelingLoss.forward."""
    k = cfg["k"]
    time_subsample = cfg["time_subsample"]
    future_subsample = cfg["future_subsample"]

    # action embedding (stand-in for ActionEmbedding)
    action = jnp.take(params["embed"], action_ids, axis=0)          # (total_steps, E)

    action_inds, target_inds, action_valids, target_valids = build_inds(
        cfg["seq_lengths"], k, time_subsample, rng
    )

    hidden_states = masked_index_select(rnn_output, action_inds[0], action_valids[0])  # (N, H)
    action_sel = masked_index_select(action, action_inds, action_valids)               # (k, N, E)

    future_preds = lstm_forward_pallas(
        action_sel, params["wx"], params["wh"], params["b"], hidden_states,
        block_n=cfg.get("block_n"),
    )                                                                                   # (k, N, H)

    N = action_sel.shape[1]
    if future_subsample < k:
        fi = np.stack([rng.permutation(k)[:future_subsample] for _ in range(N)])        # (N, fs)
    else:
        fi = np.tile(np.arange(k).reshape(k, 1), (1, N))
    offsets = np.arange(0, fi.shape[0] * k, k, dtype=np.int64).reshape(-1, 1)
    future_inds = jnp.asarray((fi + offsets).reshape(-1))

    return future_preds, action_inds, target_inds, future_inds, action_valids, target_valids


# ----------------------------------------------------------------------------
# Pure-JAX LSTM reference (lax.scan, f32) for correctness check of the kernel
# ----------------------------------------------------------------------------
def lstm_reference(x, wx, wh, b, h0):
    H = h0.shape[-1]

    def step(carry, xt):
        h, c = carry
        gates = xt @ wx + h @ wh + b
        i = jax.nn.sigmoid(gates[:, :H])
        f = jax.nn.sigmoid(gates[:, H:2 * H])
        g = jnp.tanh(gates[:, 2 * H:3 * H])
        o = jax.nn.sigmoid(gates[:, 3 * H:])
        c = f * c + i * g
        h = o * jnp.tanh(c)
        return (h, c), h

    _, hs = jax.lax.scan(step, (h0, h0), x)
    return hs


# ----------------------------------------------------------------------------
if __name__ == "__main__":
    key = jax.random.PRNGKey(0)
    k_embed, k_wih, k_whh, k_rnn, k_act = jax.random.split(key, 5)

    # small, module-consistent config
    cfg = dict(
        k=8,                   # prediction horizon (module default 20, shrunk)
        time_subsample=6,
        future_subsample=2,
        seq_lengths=[16, 16],  # 2 episodes in the mini-batch -> N = 12
        block_n=8,             # batch tile (exercises the parallel batch grid)
    )
    hidden_size = 32
    embed_dim = 16
    n_actions = 4
    total_steps = int(sum(cfg["seq_lengths"]))

    # deterministic parameters (orthogonal weights, zero biases, as in layer_init)
    W_ih = orthogonal_init(k_wih, (4 * hidden_size, embed_dim))    # (4H, E)
    W_hh = orthogonal_init(k_whh, (4 * hidden_size, hidden_size))  # (4H, H)
    params = dict(
        embed=orthogonal_init(k_embed, (n_actions, embed_dim)),
        wx=W_ih.T,                                                 # (E, 4H)
        wh=W_hh.T,                                                 # (H, 4H)
        b=jnp.zeros((4 * hidden_size,), jnp.float32),              # b_ih + b_hh = 0
    )

    # deterministic inputs
    rnn_output = jax.random.normal(k_rnn, (total_steps, hidden_size), dtype=jnp.float32)
    action_ids = jax.random.randint(k_act, (total_steps,), 0, n_actions)
    rng = np.random.default_rng(0)

    outs = action_conditioned_forward(rnn_output, action_ids, params, cfg, rng)
    future_preds = jax.block_until_ready(outs[0])

    # verify the Pallas LSTM against a pure-JAX f32 reference on the same inputs
    # (kernel matmuls are bf16 with f32 accumulation -> loosened tolerance)
    rng_chk = np.random.default_rng(0)
    action = jnp.take(params["embed"], action_ids, axis=0)
    a_inds, _, a_valids, _ = build_inds(cfg["seq_lengths"], cfg["k"], cfg["time_subsample"], rng_chk)
    h0 = masked_index_select(rnn_output, a_inds[0], a_valids[0])
    x_sel = masked_index_select(action, a_inds, a_valids)
    ref = lstm_reference(x_sel, params["wx"], params["wh"], params["b"], h0)
    np.testing.assert_allclose(np.asarray(future_preds), np.asarray(ref), rtol=2e-2, atol=2e-2)

    print("KERNEL_OK")
</pallas_src>

<mosaic_0001>
module attributes {stable_mosaic.version = 11 : i64} {
  func.func @_lstm_kernel(%arg0: i32, %arg1: memref<8x8x16xbf16, #tpu.memory_space<vmem>>, %arg2: memref<16x128xbf16, #tpu.memory_space<vmem>>, %arg3: memref<32x128xbf16, #tpu.memory_space<vmem>>, %arg4: memref<1x128xf32, #tpu.memory_space<vmem>>, %arg5: memref<8x32xf32, #tpu.memory_space<vmem>>, %arg6: memref<8x8x32xf32, #tpu.memory_space<vmem>>, %arg7: memref<64x128xf32, #tpu.memory_space<vmem>>) attributes {dimension_semantics = [#tpu.dimension_semantics<parallel>], iteration_bounds = array<i64: 2>, scalar_prefetch = 0 : i64, scratch_operands = 1 : i64, tpu.core_type = #tpu.core_type<tc>, window_params = [{transform_indices = @transform_0, window_bounds = array<i64: 8, 8, 16>}, {pipeline_mode = #tpu.pipeline_mode<synchronous>, transform_indices = @transform_1, window_bounds = array<i64: 16, 128>}, {pipeline_mode = #tpu.pipeline_mode<synchronous>, transform_indices = @transform_2, window_bounds = array<i64: 32, 128>}, {pipeline_mode = #tpu.pipeline_mode<synchronous>, transform_indices = @transform_3, window_bounds = array<i64: 1, 128>}, {transform_indices = @transform_4, window_bounds = array<i64: 8, 32>}, {transform_indices = @transform_5, window_bounds = array<i64: 8, 8, 32>}]} {
    %c0 = arith.constant 0 : index
    %c0_0 = arith.constant 0 : index
    %c0_1 = arith.constant 0 : index
    %0 = vector.load %arg1[%c0, %c0_0, %c0_1] : memref<8x8x16xbf16, #tpu.memory_space<vmem>>, vector<8x8x16xbf16>
    %1 = vector.shape_cast %0 : vector<8x8x16xbf16> to vector<64x16xbf16>
    %c0_2 = arith.constant 0 : index
    %c0_3 = arith.constant 0 : index
    %2 = vector.load %arg2[%c0_2, %c0_3] : memref<16x128xbf16, #tpu.memory_space<vmem>>, vector<16x128xbf16>
    %cst = arith.constant dense<0.000000e+00> : vector<64x128xf32>
    %3 = tpu.matmul %1, %2, %cst {dimension_numbers = #tpu.dot_dimension_numbers<[1], [0], [0], [1], [0, 0, 1, 1], [], []>} : vector<64x16xbf16>, vector<16x128xbf16>, vector<64x128xf32> -> vector<64x128xf32>
    %c0_4 = arith.constant 0 : index
    %c0_5 = arith.constant 0 : index
    %4 = vector.load %arg4[%c0_4, %c0_5] : memref<1x128xf32, #tpu.memory_space<vmem>>, vector<1x128xf32>
    %5 = vector.broadcast %4 : vector<1x128xf32> to vector<64x128xf32>
    %6 = arith.addf %3, %5 : vector<64x128xf32>
    %c0_6 = arith.constant 0 : index
    %c0_7 = arith.constant 0 : index
    %7 = vector.load %arg7[%c0_6, %c0_7] : memref<64x128xf32, #tpu.memory_space<vmem>>, vector<64x128xf32>
    tpu.vector_store %arg7[%c0_6, %c0_7], %6 {strides = array<i32>} : memref<64x128xf32, #tpu.memory_space<vmem>>, vector<64x128xf32>,
    %c0_8 = arith.constant 0 : index
    %c0_9 = arith.constant 0 : index
    %8 = vector.load %arg3[%c0_8, %c0_9] : memref<32x128xbf16, #tpu.memory_space<vmem>>, vector<32x128xbf16>
    %c0_10 = arith.constant 0 : index
    %c0_11 = arith.constant 0 : index
    %9 = vector.load %arg5[%c0_10, %c0_11] : memref<8x32xf32, #tpu.memory_space<vmem>>, vector<8x32xf32>
    %c0_i32 = arith.constant 0 : i32
    %c8_i32 = arith.constant 8 : i32
    %10 = arith.muli %c0_i32, %c8_i32 : i32
    %11 = tpu.assume_multiple %10, 8 : i32
    %12 = arith.index_cast %11 : i32 to index
    %c0_12 = arith.constant 0 : index
    %13 = vector.load %arg7[%12, %c0_12] : memref<64x128xf32, #tpu.memory_space<vmem>>, vector<8x128xf32>
    %14 = arith.truncf %9 : vector<8x32xf32> to vector<8x32xbf16>
    %cst_13 = arith.constant dense<0.000000e+00> : vector<8x128xf32>
    %15 = tpu.matmul %14, %8, %cst_13 {dimension_numbers = #tpu.dot_dimension_numbers<[1], [0], [0], [1], [0, 0, 1, 1], [], []>} : vector<8x32xbf16>, vector<32x128xbf16>, vector<8x128xf32> -> vector<8x128xf32>
    %16 = arith.addf %13, %15 : vector<8x128xf32>
    %17 = vector.extract_strided_slice %16 {offsets = [0, 0], sizes = [8, 32], strides = [1, 1]} : vector<8x128xf32> to vector<8x32xf32>
    %18 = arith.negf %17 : vector<8x32xf32>
    %19 = math.exp %18 : vector<8x32xf32>
    %cst_14 = arith.constant 1.000000e+00 : f32
    %20 = vector.broadcast %cst_14 : f32 to vector<8x32xf32>
    %21 = arith.addf %20, %19 : vector<8x32xf32>
    %22 = arith.divf %20, %21 : vector<8x32xf32>
    %23 = vector.extract_strided_slice %16 {offsets = [0, 32], sizes = [8, 32], strides = [1, 1]} : vector<8x128xf32> to vector<8x32xf32>
    %24 = arith.negf %23 : vector<8x32xf32>
    %25 = math.exp %24 : vector<8x32xf32>
    %cst_15 = arith.constant 1.000000e+00 : f32
    %26 = vector.broadcast %cst_15 : f32 to vector<8x32xf32>
    %27 = arith.addf %26, %25 : vector<8x32xf32>
    %28 = arith.divf %26, %27 : vector<8x32xf32>
    %29 = vector.extract_strided_slice %16 {offsets = [0, 64], sizes = [8, 32], strides = [1, 1]} : vector<8x128xf32> to vector<8x32xf32>
    %30 = math.tanh %29 : vector<8x32xf32>
    %31 = vector.extract_strided_slice %16 {offsets = [0, 96], sizes = [8, 32], strides = [1, 1]} : vector<8x128xf32> to vector<8x32xf32>
    %32 = arith.negf %31 : vector<8x32xf32>
    %33 = math.exp %32 : vector<8x32xf32>
    %cst_16 = arith.constant 1.000000e+00 : f32
    %34 = vector.broadcast %cst_16 : f32 to vector<8x32xf32>
    %35 = arith.addf %34, %33 : vector<8x32xf32>
    %36 = arith.divf %34, %35 : vector<8x32xf32>
    %37 = arith.mulf %28, %9 : vector<8x32xf32>
    %38 = arith.mulf %22, %30 : vector<8x32xf32>
    %39 = arith.addf %37, %38 : vector<8x32xf32>
    %40 = math.tanh %39 : vector<8x32xf32>
    %41 = arith.mulf %36, %40 : vector<8x32xf32>
    %42 = arith.index_cast %c0_i32 : i32 to index
    %c0_17 = arith.constant 0 : index
    %c0_18 = arith.constant 0 : index
    %43 = vector.load %arg6[%42, %c0_17, %c0_18] : memref<8x8x32xf32, #tpu.memory_space<vmem>>, vector<1x8x32xf32>
    %44 = vector.shape_cast %43 : vector<1x8x32xf32> to vector<8x32xf32>
    %45 = vector.shape_cast %41 : vector<8x32xf32> to vector<1x8x32xf32>
    tpu.vector_store %arg6[%42, %c0_17, %c0_18], %45 {strides = array<i32>} : memref<8x8x32xf32, #tpu.memory_space<vmem>>, vector<1x8x32xf32>,
    %c1_i32 = arith.constant 1 : i32
    %c8_i32_19 = arith.constant 8 : i32
    %46 = arith.muli %c1_i32, %c8_i32_19 : i32
    %47 = tpu.assume_multiple %46, 8 : i32
    %48 = arith.index_cast %47 : i32 to index
    %c0_20 = arith.constant 0 : index
    %49 = vector.load %arg7[%48, %c0_20] : memref<64x128xf32, #tpu.memory_space<vmem>>, vector<8x128xf32>
    %50 = arith.truncf %41 : vector<8x32xf32> to vector<8x32xbf16>
    %cst_21 = arith.constant dense<0.000000e+00> : vector<8x128xf32>
    %51 = tpu.matmul %50, %8, %cst_21 {dimension_numbers = #tpu.dot_dimension_numbers<[1], [0], [0], [1], [0, 0, 1, 1], [], []>} : vector<8x32xbf16>, vector<32x128xbf16>, vector<8x128xf32> -> vector<8x128xf32>
    %52 = arith.addf %49, %51 : vector<8x128xf32>
    %53 = vector.extract_strided_slice %52 {offsets = [0, 0], sizes = [8, 32], strides = [1, 1]} : vector<8x128xf32> to vector<8x32xf32>
    %54 = arith.negf %53 : vector<8x32xf32>
    %55 = math.exp %54 : vector<8x32xf32>
    %cst_22 = arith.constant 1.000000e+00 : f32
    %56 = vector.broadcast %cst_22 : f32 to vector<8x32xf32>
    %57 = arith.addf %56, %55 : vector<8x32xf32>
    %58 = arith.divf %56, %57 : vector<8x32xf32>
    %59 = vector.extract_strided_slice %52 {offsets = [0, 32], sizes = [8, 32], strides = [1, 1]} : vector<8x128xf32> to vector<8x32xf32>
    %60 = arith.negf %59 : vector<8x32xf32>
    %61 = math.exp %60 : vector<8x32xf32>
    %cst_23 = arith.constant 1.000000e+00 : f32
    %62 = vector.broadcast %cst_23 : f32 to vector<8x32xf32>
    %63 = arith.addf %62, %61 : vector<8x32xf32>
    %64 = arith.divf %62, %63 : vector<8x32xf32>
    %65 = vector.extract_strided_slice %52 {offsets = [0, 64], sizes = [8, 32], strides = [1, 1]} : vector<8x128xf32> to vector<8x32xf32>
    %66 = math.tanh %65 : vector<8x32xf32>
    %67 = vector.extract_strided_slice %52 {offsets = [0, 96], sizes = [8, 32], strides = [1, 1]} : vector<8x128xf32> to vector<8x32xf32>
    %68 = arith.negf %67 : vector<8x32xf32>
    %69 = math.exp %68 : vector<8x32xf32>
    %cst_24 = arith.constant 1.000000e+00 : f32
    %70 = vector.broadcast %cst_24 : f32 to vector<8x32xf32>
    %71 = arith.addf %70, %69 : vector<8x32xf32>
    %72 = arith.divf %70, %71 : vector<8x32xf32>
    %73 = arith.mulf %64, %39 : vector<8x32xf32>
    %74 = arith.mulf %58, %66 : vector<8x32xf32>
    %75 = arith.addf %73, %74 : vector<8x32xf32>
    %76 = math.tanh %75 : vector<8x32xf32>
    %77 = arith.mulf %72, %76 : vector<8x32xf32>
    %78 = arith.index_cast %c1_i32 : i32 to index
    %c0_25 = arith.constant 0 : index
    %c0_26 = arith.constant 0 : index
    %79 = vector.load %arg6[%78, %c0_25, %c0_26] : memref<8x8x32xf32, #tpu.memory_space<vmem>>, vector<1x8x32xf32>
    %80 = vector.shape_cast %79 : vector<1x8x32xf32> to vector<8x32xf32>
    %81 = vector.shape_cast %77 : vector<8x32xf32> to vector<1x8x32xf32>
    tpu.vector_store %arg6[%78, %c0_25, %c0_26], %81 {strides = array<i32>} : memref<8x8x32xf32, #tpu.memory_space<vmem>>, vector<1x8x32xf32>,
    %c2_i32 = arith.constant 2 : i32
    %c8_i32_27 = arith.constant 8 : i32
    %82 = arith.muli %c2_i32, %c8_i32_27 : i32
    %83 = tpu.assume_multiple %82, 8 : i32
    %84 = arith.index_cast %83 : i32 to index
    %c0_28 = arith.constant 0 : index
    %85 = vector.load %arg7[%84, %c0_28] : memref<64x128xf32, #tpu.memory_space<vmem>>, vector<8x128xf32>
    %86 = arith.truncf %77 : vector<8x32xf32> to vector<8x32xbf16>
    %cst_29 = arith.constant dense<0.000000e+00> : vector<8x128xf32>
    %87 = tpu.matmul %86, %8, %cst_29 {dimension_numbers = #tpu.dot_dimension_numbers<[1], [0], [0], [1], [0, 0, 1, 1], [], []>} : vector<8x32xbf16>, vector<32x128xbf16>, vector<8x128xf32> -> vector<8x128xf32>
    %88 = arith.addf %85, %87 : vector<8x128xf32>
    %89 = vector.extract_strided_slice %88 {offsets = [0, 0], sizes = [8, 32], strides = [1, 1]} : vector<8x128xf32> to vector<8x32xf32>
    %90 = arith.negf %89 : vector<8x32xf32>
    %91 = math.exp %90 : vector<8x32xf32>
    %cst_30 = arith.constant 1.000000e+00 : f32
    %92 = vector.broadcast %cst_30 : f32 to vector<8x32xf32>
    %93 = arith.addf %92, %91 : vector<8x32xf32>
    %94 = arith.divf %92, %93 : vector<8x32xf32>
    %95 = vector.extract_strided_slice %88 {offsets = [0, 32], sizes = [8, 32], strides = [1, 1]} : vector<8x128xf32> to vector<8x32xf32>
    %96 = arith.negf %95 : vector<8x32xf32>
    %97 = math.exp %96 : vector<8x32xf32>
    %cst_31 = arith.constant 1.000000e+00 : f32
    %98 = vector.broadcast %cst_31 : f32 to vector<8x32xf32>
    %99 = arith.addf %98, %97 : vector<8x32xf32>
    %100 = arith.divf %98, %99 : vector<8x32xf32>
    %101 = vector.extract_strided_slice %88 {offsets = [0, 64], sizes = [8, 32], strides = [1, 1]} : vector<8x128xf32> to vector<8x32xf32>
    %102 = math.tanh %101 : vector<8x32xf32>
    %103 = vector.extract_strided_slice %88 {offsets = [0, 96], sizes = [8, 32], strides = [1, 1]} : vector<8x128xf32> to vector<8x32xf32>
    %104 = arith.negf %103 : vector<8x32xf32>
    %105 = math.exp %104 : vector<8x32xf32>
    %cst_32 = arith.constant 1.000000e+00 : f32
    %106 = vector.broadcast %cst_32 : f32 to vector<8x32xf32>
    %107 = arith.addf %106, %105 : vector<8x32xf32>
    %108 = arith.divf %106, %107 : vector<8x32xf32>
    %109 = arith.mulf %100, %75 : vector<8x32xf32>
    %110 = arith.mulf %94, %102 : vector<8x32xf32>
    %111 = arith.addf %109, %110 : vector<8x32xf32>
    %112 = math.tanh %111 : vector<8x32xf32>
    %113 = arith.mulf %108, %112 : vector<8x32xf32>
    %114 = arith.index_cast %c2_i32 : i32 to index
    %c0_33 = arith.constant 0 : index
    %c0_34 = arith.constant 0 : index
    %115 = vector.load %arg6[%114, %c0_33, %c0_34] : memref<8x8x32xf32, #tpu.memory_space<vmem>>, vector<1x8x32xf32>
    %116 = vector.shape_cast %115 : vector<1x8x32xf32> to vector<8x32xf32>
    %117 = vector.shape_cast %113 : vector<8x32xf32> to vector<1x8x32xf32>
    tpu.vector_store %arg6[%114, %c0_33, %c0_34], %117 {strides = array<i32>} : memref<8x8x32xf32, #tpu.memory_space<vmem>>, vector<1x8x32xf32>,
    %c3_i32 = arith.constant 3 : i32
    %c8_i32_35 = arith.constant 8 : i32
    %118 = arith.muli %c3_i32, %c8_i32_35 : i32
    %119 = tpu.assume_multiple %118, 8 : i32
    %120 = arith.index_cast %119 : i32 to index
    %c0_36 = arith.constant 0 : index
    %121 = vector.load %arg7[%120, %c0_36] : memref<64x128xf32, #tpu.memory_space<vmem>>, vector<8x128xf32>
    %122 = arith.truncf %113 : vector<8x32xf32> to vector<8x32xbf16>
    %cst_37 = arith.constant dense<0.000000e+00> : vector<8x128xf32>
    %123 = tpu.matmul %122, %8, %cst_37 {dimension_numbers = #tpu.dot_dimension_numbers<[1], [0], [0], [1], [0, 0, 1, 1], [], []>} : vector<8x32xbf16>, vector<32x128xbf16>, vector<8x128xf32> -> vector<8x128xf32>
    %124 = arith.addf %121, %123 : vector<8x128xf32>
    %125 = vector.extract_strided_slice %124 {offsets = [0, 0], sizes = [8, 32], strides = [1, 1]} : vector<8x128xf32> to vector<8x32xf32>
    %126 = arith.negf %125 : vector<8x32xf32>
    %127 = math.exp %126 : vector<8x32xf32>
    %cst_38 = arith.constant 1.000000e+00 : f32
    %128 = vector.broadcast %cst_38 : f32 to vector<8x32xf32>
    %129 = arith.addf %128, %127 : vector<8x32xf32>
    %130 = arith.divf %128, %129 : vector<8x32xf32>
    %131 = vector.extract_strided_slice %124 {offsets = [0, 32], sizes = [8, 32], strides = [1, 1]} : vector<8x128xf32> to vector<8x32xf32>
    %132 = arith.negf %131 : vector<8x32xf32>
    %133 = math.exp %132 : vector<8x32xf32>
    %cst_39 = arith.constant 1.000000e+00 : f32
    %134 = vector.broadcast %cst_39 : f32 to vector<8x32xf32>
    %135 = arith.addf %134, %133 : vector<8x32xf32>
    %136 = arith.divf %134, %135 : vector<8x32xf32>
    %137 = vector.extract_strided_slice %124 {offsets = [0, 64], sizes = [8, 32], strides = [1, 1]} : vector<8x128xf32> to vector<8x32xf32>
    %138 = math.tanh %137 : vector<8x32xf32>
    %139 = vector.extract_strided_slice %124 {offsets = [0, 96], sizes = [8, 32], strides = [1, 1]} : vector<8x128xf32> to vector<8x32xf32>
    %140 = arith.negf %139 : vector<8x32xf32>
    %141 = math.exp %140 : vector<8x32xf32>
    %cst_40 = arith.constant 1.000000e+00 : f32
    %142 = vector.broadcast %cst_40 : f32 to vector<8x32xf32>
    %143 = arith.addf %142, %141 : vector<8x32xf32>
    %144 = arith.divf %142, %143 : vector<8x32xf32>
    %145 = arith.mulf %136, %111 : vector<8x32xf32>
    %146 = arith.mulf %130, %138 : vector<8x32xf32>
    %147 = arith.addf %145, %146 : vector<8x32xf32>
    %148 = math.tanh %147 : vector<8x32xf32>
    %149 = arith.mulf %144, %148 : vector<8x32xf32>
    %150 = arith.index_cast %c3_i32 : i32 to index
    %c0_41 = arith.constant 0 : index
    %c0_42 = arith.constant 0 : index
    %151 = vector.load %arg6[%150, %c0_41, %c0_42] : memref<8x8x32xf32, #tpu.memory_space<vmem>>, vector<1x8x32xf32>
    %152 = vector.shape_cast %151 : vector<1x8x32xf32> to vector<8x32xf32>
    %153 = vector.shape_cast %149 : vector<8x32xf32> to vector<1x8x32xf32>
    tpu.vector_store %arg6[%150, %c0_41, %c0_42], %153 {strides = array<i32>} : memref<8x8x32xf32, #tpu.memory_space<vmem>>, vector<1x8x32xf32>,
    %c4_i32 = arith.constant 4 : i32
    %c8_i32_43 = arith.constant 8 : i32
    %154 = arith.muli %c4_i32, %c8_i32_43 : i32
    %155 = tpu.assume_multiple %154, 8 : i32
    %156 = arith.index_cast %155 : i32 to index
    %c0_44 = arith.constant 0 : index
    %157 = vector.load %arg7[%156, %c0_44] : memref<64x128xf32, #tpu.memory_space<vmem>>, vector<8x128xf32>
    %158 = arith.truncf %149 : vector<8x32xf32> to vector<8x32xbf16>
    %cst_45 = arith.constant dense<0.000000e+00> : vector<8x128xf32>
    %159 = tpu.matmul %158, %8, %cst_45 {dimension_numbers = #tpu.dot_dimension_numbers<[1], [0], [0], [1], [0, 0, 1, 1], [], []>} : vector<8x32xbf16>, vector<32x128xbf16>, vector<8x128xf32> -> vector<8x128xf32>
    %160 = arith.addf %157, %159 : vector<8x128xf32>
    %161 = vector.extract_strided_slice %160 {offsets = [0, 0], sizes = [8, 32], strides = [1, 1]} : vector<8x128xf32> to vector<8x32xf32>
    %162 = arith.negf %161 : vector<8x32xf32>
    %163 = math.exp %162 : vector<8x32xf32>
    %cst_46 = arith.constant 1.000000e+00 : f32
    %164 = vector.broadcast %cst_46 : f32 to vector<8x32xf32>
    %165 = arith.addf %164, %163 : vector<8x32xf32>
    %166 = arith.divf %164, %165 : vector<8x32xf32>
    %167 = vector.extract_strided_slice %160 {offsets = [0, 32], sizes = [8, 32], strides = [1, 1]} : vector<8x128xf32> to vector<8x32xf32>
    %168 = arith.negf %167 : vector<8x32xf32>
    %169 = math.exp %168 : vector<8x32xf32>
    %cst_47 = arith.constant 1.000000e+00 : f32
    %170 = vector.broadcast %cst_47 : f32 to vector<8x32xf32>
    %171 = arith.addf %170, %169 : vector<8x32xf32>
    %172 = arith.divf %170, %171 : vector<8x32xf32>
    %173 = vector.extract_strided_slice %160 {offsets = [0, 64], sizes = [8, 32], strides = [1, 1]} : vector<8x128xf32> to vector<8x32xf32>
    %174 = math.tanh %173 : vector<8x32xf32>
    %175 = vector.extract_strided_slice %160 {offsets = [0, 96], sizes = [8, 32], strides = [1, 1]} : vector<8x128xf32> to vector<8x32xf32>
    %176 = arith.negf %175 : vector<8x32xf32>
    %177 = math.exp %176 : vector<8x32xf32>
    %cst_48 = arith.constant 1.000000e+00 : f32
    %178 = vector.broadcast %cst_48 : f32 to vector<8x32xf32>
    %179 = arith.addf %178, %177 : vector<8x32xf32>
    %180 = arith.divf %178, %179 : vector<8x32xf32>
    %181 = arith.mulf %172, %147 : vector<8x32xf32>
    %182 = arith.mulf %166, %174 : vector<8x32xf32>
    %183 = arith.addf %181, %182 : vector<8x32xf32>
    %184 = math.tanh %183 : vector<8x32xf32>
    %185 = arith.mulf %180, %184 : vector<8x32xf32>
    %186 = arith.index_cast %c4_i32 : i32 to index
    %c0_49 = arith.constant 0 : index
    %c0_50 = arith.constant 0 : index
    %187 = vector.load %arg6[%186, %c0_49, %c0_50] : memref<8x8x32xf32, #tpu.memory_space<vmem>>, vector<1x8x32xf32>
    %188 = vector.shape_cast %187 : vector<1x8x32xf32> to vector<8x32xf32>
    %189 = vector.shape_cast %185 : vector<8x32xf32> to vector<1x8x32xf32>
    tpu.vector_store %arg6[%186, %c0_49, %c0_50], %189 {strides = array<i32>} : memref<8x8x32xf32, #tpu.memory_space<vmem>>, vector<1x8x32xf32>,
    %c5_i32 = arith.constant 5 : i32
    %c8_i32_51 = arith.constant 8 : i32
    %190 = arith.muli %c5_i32, %c8_i32_51 : i32
    %191 = tpu.assume_multiple %190, 8 : i32
    %192 = arith.index_cast %191 : i32 to index
    %c0_52 = arith.constant 0 : index
    %193 = vector.load %arg7[%192, %c0_52] : memref<64x128xf32, #tpu.memory_space<vmem>>, vector<8x128xf32>
    %194 = arith.truncf %185 : vector<8x32xf32> to vector<8x32xbf16>
    %cst_53 = arith.constant dense<0.000000e+00> : vector<8x128xf32>
    %195 = tpu.matmul %194, %8, %cst_53 {dimension_numbers = #tpu.dot_dimension_numbers<[1], [0], [0], [1], [0, 0, 1, 1], [], []>} : vector<8x32xbf16>, vector<32x128xbf16>, vector<8x128xf32> -> vector<8x128xf32>
    %196 = arith.addf %193, %195 : vector<8x128xf32>
    %197 = vector.extract_strided_slice %196 {offsets = [0, 0], sizes = [8, 32], strides = [1, 1]} : vector<8x128xf32> to vector<8x32xf32>
    %198 = arith.negf %197 : vector<8x32xf32>
    %199 = math.exp %198 : vector<8x32xf32>
    %cst_54 = arith.constant 1.000000e+00 : f32
    %200 = vector.broadcast %cst_54 : f32 to vector<8x32xf32>
    %201 = arith.addf %200, %199 : vector<8x32xf32>
    %202 = arith.divf %200, %201 : vector<8x32xf32>
    %203 = vector.extract_strided_slice %196 {offsets = [0, 32], sizes = [8, 32], strides = [1, 1]} : vector<8x128xf32> to vector<8x32xf32>
    %204 = arith.negf %203 : vector<8x32xf32>
    %205 = math.exp %204 : vector<8x32xf32>
    %cst_55 = arith.constant 1.000000e+00 : f32
    %206 = vector.broadcast %cst_55 : f32 to vector<8x32xf32>
    %207 = arith.addf %206, %205 : vector<8x32xf32>
    %208 = arith.divf %206, %207 : vector<8x32xf32>
    %209 = vector.extract_strided_slice %196 {offsets = [0, 64], sizes = [8, 32], strides = [1, 1]} : vector<8x128xf32> to vector<8x32xf32>
    %210 = math.tanh %209 : vector<8x32xf32>
    %211 = vector.extract_strided_slice %196 {offsets = [0, 96], sizes = [8, 32], strides = [1, 1]} : vector<8x128xf32> to vector<8x32xf32>
    %212 = arith.negf %211 : vector<8x32xf32>
    %213 = math.exp %212 : vector<8x32xf32>
    %cst_56 = arith.constant 1.000000e+00 : f32
    %214 = vector.broadcast %cst_56 : f32 to vector<8x32xf32>
    %215 = arith.addf %214, %213 : vector<8x32xf32>
    %216 = arith.divf %214, %215 : vector<8x32xf32>
    %217 = arith.mulf %208, %183 : vector<8x32xf32>
    %218 = arith.mulf %202, %210 : vector<8x32xf32>
    %219 = arith.addf %217, %218 : vector<8x32xf32>
    %220 = math.tanh %219 : vector<8x32xf32>
    %221 = arith.mulf %216, %220 : vector<8x32xf32>
    %222 = arith.index_cast %c5_i32 : i32 to index
    %c0_57 = arith.constant 0 : index
    %c0_58 = arith.constant 0 : index
    %223 = vector.load %arg6[%222, %c0_57, %c0_58] : memref<8x8x32xf32, #tpu.memory_space<vmem>>, vector<1x8x32xf32>
    %224 = vector.shape_cast %223 : vector<1x8x32xf32> to vector<8x32xf32>
    %225 = vector.shape_cast %221 : vector<8x32xf32> to vector<1x8x32xf32>
    tpu.vector_store %arg6[%222, %c0_57, %c0_58], %225 {strides = array<i32>} : memref<8x8x32xf32, #tpu.memory_space<vmem>>, vector<1x8x32xf32>,
    %c6_i32 = arith.constant 6 : i32
    %c8_i32_59 = arith.constant 8 : i32
    %226 = arith.muli %c6_i32, %c8_i32_59 : i32
    %227 = tpu.assume_multiple %226, 8 : i32
    %228 = arith.index_cast %227 : i32 to index
    %c0_60 = arith.constant 0 : index
    %229 = vector.load %arg7[%228, %c0_60] : memref<64x128xf32, #tpu.memory_space<vmem>>, vector<8x128xf32>
    %230 = arith.truncf %221 : vector<8x32xf32> to vector<8x32xbf16>
    %cst_61 = arith.constant dense<0.000000e+00> : vector<8x128xf32>
    %231 = tpu.matmul %230, %8, %cst_61 {dimension_numbers = #tpu.dot_dimension_numbers<[1], [0], [0], [1], [0, 0, 1, 1], [], []>} : vector<8x32xbf16>, vector<32x128xbf16>, vector<8x128xf32> -> vector<8x128xf32>
    %232 = arith.addf %229, %231 : vector<8x128xf32>
    %233 = vector.extract_strided_slice %232 {offsets = [0, 0], sizes = [8, 32], strides = [1, 1]} : vector<8x128xf32> to vector<8x32xf32>
    %234 = arith.negf %233 : vector<8x32xf32>
    %235 = math.exp %234 : vector<8x32xf32>
    %cst_62 = arith.constant 1.000000e+00 : f32
    %236 = vector.broadcast %cst_62 : f32 to vector<8x32xf32>
    %237 = arith.addf %236, %235 : vector<8x32xf32>
    %238 = arith.divf %236, %237 : vector<8x32xf32>
    %239 = vector.extract_strided_slice %232 {offsets = [0, 32], sizes = [8, 32], strides = [1, 1]} : vector<8x128xf32> to vector<8x32xf32>
    %240 = arith.negf %239 : vector<8x32xf32>
    %241 = math.exp %240 : vector<8x32xf32>
    %cst_63 = arith.constant 1.000000e+00 : f32
    %242 = vector.broadcast %cst_63 : f32 to vector<8x32xf32>
    %243 = arith.addf %242, %241 : vector<8x32xf32>
    %244 = arith.divf %242, %243 : vector<8x32xf32>
    %245 = vector.extract_strided_slice %232 {offsets = [0, 64], sizes = [8, 32], strides = [1, 1]} : vector<8x128xf32> to vector<8x32xf32>
    %246 = math.tanh %245 : vector<8x32xf32>
    %247 = vector.extract_strided_slice %232 {offsets = [0, 96], sizes = [8, 32], strides = [1, 1]} : vector<8x128xf32> to vector<8x32xf32>
    %248 = arith.negf %247 : vector<8x32xf32>
    %249 = math.exp %248 : vector<8x32xf32>
    %cst_64 = arith.constant 1.000000e+00 : f32
    %250 = vector.broadcast %cst_64 : f32 to vector<8x32xf32>
    %251 = arith.addf %250, %249 : vector<8x32xf32>
    %252 = arith.divf %250, %251 : vector<8x32xf32>
    %253 = arith.mulf %244, %219 : vector<8x32xf32>
    %254 = arith.mulf %238, %246 : vector<8x32xf32>
    %255 = arith.addf %253, %254 : vector<8x32xf32>
    %256 = math.tanh %255 : vector<8x32xf32>
    %257 = arith.mulf %252, %256 : vector<8x32xf32>
    %258 = arith.index_cast %c6_i32 : i32 to index
    %c0_65 = arith.constant 0 : index
    %c0_66 = arith.constant 0 : index
    %259 = vector.load %arg6[%258, %c0_65, %c0_66] : memref<8x8x32xf32, #tpu.memory_space<vmem>>, vector<1x8x32xf32>
    %260 = vector.shape_cast %259 : vector<1x8x32xf32> to vector<8x32xf32>
    %261 = vector.shape_cast %257 : vector<8x32xf32> to vector<1x8x32xf32>
    tpu.vector_store %arg6[%258, %c0_65, %c0_66], %261 {strides = array<i32>} : memref<8x8x32xf32, #tpu.memory_space<vmem>>, vector<1x8x32xf32>,
    %c7_i32 = arith.constant 7 : i32
    %c8_i32_67 = arith.constant 8 : i32
    %262 = arith.muli %c7_i32, %c8_i32_67 : i32
    %263 = tpu.assume_multiple %262, 8 : i32
    %264 = arith.index_cast %263 : i32 to index
    %c0_68 = arith.constant 0 : index
    %265 = vector.load %arg7[%264, %c0_68] : memref<64x128xf32, #tpu.memory_space<vmem>>, vector<8x128xf32>
    %266 = arith.truncf %257 : vector<8x32xf32> to vector<8x32xbf16>
    %cst_69 = arith.constant dense<0.000000e+00> : vector<8x128xf32>
    %267 = tpu.matmul %266, %8, %cst_69 {dimension_numbers = #tpu.dot_dimension_numbers<[1], [0], [0], [1], [0, 0, 1, 1], [], []>} : vector<8x32xbf16>, vector<32x128xbf16>, vector<8x128xf32> -> vector<8x128xf32>
    %268 = arith.addf %265, %267 : vector<8x128xf32>
    %269 = vector.extract_strided_slice %268 {offsets = [0, 0], sizes = [8, 32], strides = [1, 1]} : vector<8x128xf32> to vector<8x32xf32>
    %270 = arith.negf %269 : vector<8x32xf32>
    %271 = math.exp %270 : vector<8x32xf32>
    %cst_70 = arith.constant 1.000000e+00 : f32
    %272 = vector.broadcast %cst_70 : f32 to vector<8x32xf32>
    %273 = arith.addf %272, %271 : vector<8x32xf32>
    %274 = arith.divf %272, %273 : vector<8x32xf32>
    %275 = vector.extract_strided_slice %268 {offsets = [0, 32], sizes = [8, 32], strides = [1, 1]} : vector<8x128xf32> to vector<8x32xf32>
    %276 = arith.negf %275 : vector<8x32xf32>
    %277 = math.exp %276 : vector<8x32xf32>
    %cst_71 = arith.constant 1.000000e+00 : f32
    %278 = vector.broadcast %cst_71 : f32 to vector<8x32xf32>
    %279 = arith.addf %278, %277 : vector<8x32xf32>
    %280 = arith.divf %278, %279 : vector<8x32xf32>
    %281 = vector.extract_strided_slice %268 {offsets = [0, 64], sizes = [8, 32], strides = [1, 1]} : vector<8x128xf32> to vector<8x32xf32>
    %282 = math.tanh %281 : vector<8x32xf32>
    %283 = vector.extract_strided_slice %268 {offsets = [0, 96], sizes = [8, 32], strides = [1, 1]} : vector<8x128xf32> to vector<8x32xf32>
    %284 = arith.negf %283 : vector<8x32xf32>
    %285 = math.exp %284 : vector<8x32xf32>
    %cst_72 = arith.constant 1.000000e+00 : f32
    %286 = vector.broadcast %cst_72 : f32 to vector<8x32xf32>
    %287 = arith.addf %286, %285 : vector<8x32xf32>
    %288 = arith.divf %286, %287 : vector<8x32xf32>
    %289 = arith.mulf %280, %255 : vector<8x32xf32>
    %290 = arith.mulf %274, %282 : vector<8x32xf32>
    %291 = arith.addf %289, %290 : vector<8x32xf32>
    %292 = math.tanh %291 : vector<8x32xf32>
    %293 = arith.mulf %288, %292 : vector<8x32xf32>
    %294 = arith.index_cast %c7_i32 : i32 to index
    %c0_73 = arith.constant 0 : index
    %c0_74 = arith.constant 0 : index
    %295 = vector.load %arg6[%294, %c0_73, %c0_74] : memref<8x8x32xf32, #tpu.memory_space<vmem>>, vector<1x8x32xf32>
    %296 = vector.shape_cast %295 : vector<1x8x32xf32> to vector<8x32xf32>
    %297 = vector.shape_cast %293 : vector<8x32xf32> to vector<1x8x32xf32>
    tpu.vector_store %arg6[%294, %c0_73, %c0_74], %297 {strides = array<i32>} : memref<8x8x32xf32, #tpu.memory_space<vmem>>, vector<1x8x32xf32>,
    %c8_i32_75 = arith.constant 8 : i32
    return
  }
  func.func @transform_0(%arg0: i32) -> (i32, i32, i32) {
    %c0_i32 = arith.constant 0 : i32
    %c0_i32_0 = arith.constant 0 : i32
    %c0_i32_1 = arith.constant 0 : i32
    return %c0_i32, %arg0, %c0_i32_0 : i32, i32, i32
  }
  func.func @transform_1(%arg0: i32) -> (i32, i32) {
    %c0_i32 = arith.constant 0 : i32
    %c0_i32_0 = arith.constant 0 : i32
    %c0_i32_1 = arith.constant 0 : i32
    return %c0_i32, %c0_i32_0 : i32, i32
  }
  func.func @transform_2(%arg0: i32) -> (i32, i32) {
    %c0_i32 = arith.constant 0 : i32
    %c0_i32_0 = arith.constant 0 : i32
    %c0_i32_1 = arith.constant 0 : i32
    return %c0_i32, %c0_i32_0 : i32, i32
  }
  func.func @transform_3(%arg0: i32) -> (i32, i32) {
    %c0_i32 = arith.constant 0 : i32
    %c0_i32_0 = arith.constant 0 : i32
    %c0_i32_1 = arith.constant 0 : i32
    return %c0_i32, %c0_i32_0 : i32, i32
  }
  func.func @transform_4(%arg0: i32) -> (i32, i32) {
    %c0_i32 = arith.constant 0 : i32
    %c0_i32_0 = arith.constant 0 : i32
    return %arg0, %c0_i32 : i32, i32
  }
  func.func @transform_5(%arg0: i32) -> (i32, i32, i32) {
    %c0_i32 = arith.constant 0 : i32
    %c0_i32_0 = arith.constant 0 : i32
    %c0_i32_1 = arith.constant 0 : i32
    return %c0_i32, %arg0, %c0_i32_0 : i32, i32, i32
  }
}

</mosaic_0001>

<bundles_post_ra>
// kernel: tpu_custom_call.1
= control target key start
LH: loop header
LB: loop body
LE: loop exit
PB: predicated region body
PF: predicated region fallthrough
CT: control target
= control target key end

     0   :  { %s2220_s0 = inlined_call_operand.hbm [shape: bf16[8,16,16], index: 0, kind: input, shape index: {}]   ;;  %s2221_s1 = inlined_call_operand.hbm [shape: bf16[16,128], index: 1, kind: input, shape index: {}]   ;;  %s2222_s2 = inlined_call_operand.hbm [shape: bf16[32,128], index: 2, kind: input, shape index: {}]   ;;  %s2223_s3 = inlined_call_operand.vmem [shape: f32[1,128], index: 3, kind: input, shape index: {}]   ;;  %s2224_s4 = inlined_call_operand.hbm [shape: f32[16,32], index: 4, kind: input, shape index: {}]   ;;  %s2225_s5 = inlined_call_operand.hbm [shape: f32[8,16,32], index: 5, kind: output, shape index: {}]  }
   0x1   :  { %2232 = sst [smem:[#allocation16_spill]] %s2220_s0 }
   0x2   :  { %2233 = sst [smem:[#allocation17_spill]] %s2221_s1 }
   0x3   :  { %2234 = sst [smem:[#allocation18_spill]] %s2222_s2 }
   0x4   :  { %10 = vsyncpa [#allocation4], 0 }
   0x5   :  { %12 = vsyncpa [#allocation4 + $0x1], 0 }
   0x6   :  { %13 = vsyncpa [#allocation7], 0 }
   0x7   :  { %14 = vsyncpa [#allocation10], 0 }
   0x8   :  { %16 = vsyncpa [#allocation10 + $0x1], 0 }
   0x9   :  { %17 = vsyncpa [#allocation5], 0 }
   0xa   :  { %19 = vsyncpa [#allocation5 + $0x1], 0  ;;  %s1770_s18 = smov 0   ;;  %s1772_s19 = smov 0  }
   0xb   :  { %s1774_s20 = smov 0   ;;  %s1776_s21 = smov 0  }
   0xc LB: > { %s1791_s22 = sadd.s32 4294967295, %s1723_s21   ;;  %s1223_s23 = sadd.s32 4294967294, %s1723_s21   ;;  %s1723_s21 = sphi %s1776_s21, %s2259_s21   ;;  %s1719_s20 = sphi %s1774_s20, %s2258_s20   ;;  %s1715_s19 = sphi %s1772_s19, %s2257_s19   ;;  %s1711_s18 = sphi %s1770_s18, %s2256_s18  }
   0xd   : > { %s1795_s24 = sadd.s32 1, %s1723_s21   ;;  %s32_s25 = sadd.s32 1, %s1719_s20 }
   0xe   : > { %s29_s26 = ssub.s32 %s1723_s21, %s1795_s24  ;;  %p39_p0 = scmp.ne.s32.totalorder %s1719_s20, %s1715_s19 }
   0xf   : > { %p30_p1 = scmp.eq.s32.totalorder %s29_s26, 0  ;;  %p40_p2 = scmp.eq.s32.totalorder %s1723_s21, 0 }
  0x10   : > { %p45_p3 = scmp.ne.s32.totalorder %s1715_s19, %s1711_s18  ;;  %p2226_p4 = scmp.eq.s32.totalorder %s1791_s22, 0 }
  0x11   : > { %s1807_s27 = scalar_select %p30_p1, %s1719_s20, %s32_s25  }
  0x12   : > { %p1809_p5 = por %p40_p2, %p39_p0  ;;  %p1815_p6 = por %p2226_p4, %p45_p3 }
  0x13   : > { %p158_p7 = scmp.eq.s32.totalorder %s1791_s22, 1  ;;  %p164_p8 = scmp.eq.s32.totalorder %s1223_s23, 1 }
  0x14   : > { %s2235_s28 = scalar_select %p1809_p5, 1, 0 }
  0x15   : > { %s2236_s29 = scalar_select %p1815_p6, 1, 0 }
  0x16   : > { %p1224_p9 = scmp.ge.s32.totalorder %s1723_s21, 1  ;;  %p171_p10 = scmp.lt.s32.totalorder %s1723_s21, 3 }
  0x17   : > { %p1822_p11 = por %p158_p7, %p39_p0  ;;  %p1826_p12 = por %p164_p8, %p45_p3 }
  0x18   : > { %p1830_p13 = pnand %p1224_p9, %p171_p10  ;;  %s1725_s8 = smov [#allocation6]  }
  0x19   : > { %s2237_s30 = scalar_select %p1822_p11, 1, 0 }
  0x1a   : > { %s2238_s6 = scalar_select %p1826_p12, 1, 0 }
  0x1b   : > { %s2239_s7 = scalar_select %p1830_p13, 1, 0 }
  0x1c   : > { %p1394_p1 = pneg %p1830_p13  ;;  %s183_s9 = sshll.u32 %s1725_s8, 4  ;;  %s184_s9 = int_to_ptr.vmem [resolvable:$true] %s183_s9 }
  0x1d   : > { %s1726_s11 = smov [#allocation8]   ;;  %s2241_s1 = sld [smem:[#allocation17_spill]] }
  0x1e   : > { %p1838_p2 = pnand %p1394_p1, %p2226_p4  ;;  %s196_s12 = sshll.u32 %s1726_s11, 4  ;;  %s197_s12 = int_to_ptr.vmem [resolvable:$true] %s196_s12 }
  0x20   : > { %p1535_p8 = pneg %p1838_p2 }
  0x23   : > { %s1533_s15 = scalar_lea.hbm %s2241_s1, 128 }
  0x24   : > { %p1534_p7 = scmp.ne.s32.totalorder %s2241_s1, %s1533_s15  ;;  %p1540_p1 = scmp.lt.u32.totalorder %s1533_s15, %s2241_s1 }
  0x26   : > { %p1536_p9 = pnand %p1535_p8, %p1534_p7 }
  0x28   : > { %p1537_p10 = pneg %p1536_p9 }
  0x2a   : > { %p1542_p0 = pnand %p1540_p1, %p1537_p10 }
  0x2c   : > { %1545 = shalt.err (!%p1542_p0)
}
  0x2d   : > { %s1546_s26 = scalar_lea.vmem %s184_s9, 128  ;;  %p1554_p11 = scmp.lt.s32.totalorder %s184_s9, %s184_s9 }
  0x2e   : > { %p1547_p4 = scmp.ne.s32.totalorder %s184_s9, %s1546_s26  ;;  %p1555_p6 = scmp.lt.s32.totalorder %s1546_s26, %s1546_s26 }
  0x30   : > { %p1549_p3 = pnand %p1547_p4, %p1535_p8  ;;  %p1556_p13 = por %p1555_p6, %p1554_p11 }
  0x32   : > { %p1550_p12 = pneg %p1549_p3 }
  0x34   : > { %p1557_p5 = pnand %p1556_p13, %p1550_p12 }
  0x36   : > { %1560 = shalt.err (!%p1557_p5)
}
  0x37   : > { %s2231_s8 = smov 64   ;;  %s1728_s11 = smov 4  }
  0x38   : > { %1397 = dma.hbm_to_vmem [thread:$0]  (!%p1838_p2), %s2241_s1, 128, %s184_s9, [#allocation7], %s2231_s8, %s2231_s8, %s1728_s11  }
  0x39   : > { %p2242_p4 = scmp.ne.s32.totalorder %s2235_s28, 0  ;;  %p2243_p0 = scmp.lt.s32.totalorder %s1723_s21, 2 }
  0x3a   : > { %s2245_s2 = sld [smem:[#allocation18_spill]] }
  0x3b   : > { %p1873_p3 = pnand %p2243_p0, %p2242_p4 }
  0x3d   : > { %s2244_s15 = scalar_select %p1873_p3, 1, 0 }
  0x40   : > { %s1561_s23 = scalar_lea.hbm %s2245_s2, 256 }
  0x41   : > { %p1562_p5 = scmp.ne.s32.totalorder %s2245_s2, %s1561_s23  ;;  %p1568_p12 = scmp.lt.u32.totalorder %s1561_s23, %s2245_s2 }
  0x43   : > { %p1564_p6 = pnand %p1562_p5, %p1535_p8 }
  0x45   : > { %p1565_p11 = pneg %p1564_p6 }
  0x47   : > { %p1570_p13 = pnand %p1568_p12, %p1565_p11 }
  0x49   : > { %1573 = shalt.err (!%p1570_p13)
}
  0x4a   : > { %s1574_s13 = scalar_lea.vmem %s197_s12, 256  ;;  %p1582_p1 = scmp.lt.s32.totalorder %s197_s12, %s197_s12 }
  0x4b   : > { %p1575_p7 = scmp.ne.s32.totalorder %s197_s12, %s1574_s13  ;;  %p1583_p4 = scmp.lt.s32.totalorder %s1574_s13, %s1574_s13 }
  0x4d   : > { %p1577_p9 = pnand %p1575_p7, %p1535_p8  ;;  %p1584_p0 = por %p1583_p4, %p1582_p1 }
  0x4f   : > { %p1578_p10 = pneg %p1577_p9 }
  0x51   : > { %p1585_p3 = pnand %p1584_p0, %p1578_p10 }
  0x53   : > { %1588 = shalt.err (!%p1585_p3)
}
  0x54   : > { %1400 = dma.hbm_to_vmem [thread:$0]  (!%p1838_p2), %s2245_s2, 256, %s197_s12, [#allocation7], %s2231_s8, %s2231_s8, %s1728_s11  }
  0x55   : > { %s1901_s17 = sand.u32 1, %s1719_s20   ;;  %s1229_s25 = sshll.u32 %s1723_s21, 6 }
  0x56   : > { %s1228_s23 = sshll.u32 %s1901_s17, 5  ;;  %s2246_s0 = sld [smem:[#allocation16_spill]] }
  0x57   : > { %s217_s28 = scalar_lea.vmem [#allocation3], %s1228_s23  ;;  %s214_s12 = scalar_lea.sflag [#allocation4], %s1901_s17 }
  0x58   : > { %s223_s13 = sshll.u32 %s217_s28, 4  ;;  %p2247_p8 = scmp.ne.s32.totalorder %s2244_s15, 0  ;;  %s1910_s13 = int_to_ptr.vmem [resolvable:$true] %s223_s13 }
  0x5a   : > { %p1591_p3 = pneg %p2247_p8 }
  0x5c   : > { %s1908_s10 = scalar_lea.hbm %s2246_s0, %s1229_s25  ;;  %s1594_s26 = scalar_lea.hbm %s2246_s0, 1024 }
  0x5d   : > { %s1589_s14 = scalar_lea.hbm %s1908_s10, 512  ;;  %p1595_p11 = scmp.lt.u32.totalorder %s1908_s10, %s2246_s0 }
  0x5e   : > { %p1590_p2 = scmp.ne.s32.totalorder %s1908_s10, %s1589_s14  ;;  %p1596_p12 = scmp.lt.u32.totalorder %s1594_s26, %s1589_s14 }
  0x5f   : > { %p1598_p7 = scmp.lt.u32.totalorder %s1589_s14, %s1908_s10 }
  0x60   : > { %p1592_p5 = pnand %p1591_p3, %p1590_p2  ;;  %p1597_p13 = por %p1596_p12, %p1595_p11 }
  0x62   : > { %p1593_p6 = pneg %p1592_p5  ;;  %p1599_p9 = por %p1598_p7, %p1597_p13 }
  0x64   : > { %p1600_p10 = pnand %p1599_p9, %p1593_p6 }
  0x66   : > { %1603 = shalt.err (!%p1600_p10)
}
  0x67   : > { %s1604_s23 = scalar_lea.vmem %s1910_s13, 512  ;;  %s1729_s28 = smov [#allocation3]  }
  0x68   : > { %p1605_p1 = scmp.ne.s32.totalorder %s1910_s13, %s1604_s23  ;;  %s1609_s16 = sshll.u32 %s1729_s28, 4  ;;  %s1610_s16 = int_to_ptr.vmem [resolvable:$false] %s1609_s16 }
  0x69   : > { %s1611_s8 = scalar_lea.vmem %s1610_s16, 1024  ;;  %p1612_p2 = scmp.lt.s32.totalorder %s1910_s13, %s1610_s16 }
  0x6a   : > { %p1607_p4 = pnand %p1605_p1, %p1591_p3  ;;  %p1613_p5 = scmp.lt.s32.totalorder %s1611_s8, %s1604_s23 }
  0x6c   : > { %p1608_p0 = pneg %p1607_p4  ;;  %p1614_p11 = por %p1613_p5, %p1612_p2 }
  0x6e   : > { %p1615_p12 = pnand %p1614_p11, %p1608_p0 }
  0x70   : > { %1618 = shalt.err (!%p1615_p12)
}
  0x71   : > { %s1730_s14 = smov 128   ;;  %s2248_s25 = smov 64  }
  0x72   : > { %1404 = dma.hbm_to_vmem [thread:$0]  (!%p2247_p8), %s1908_s10, 512, %s1910_s13, %s214_s12, %s1730_s14, %s2248_s25, %s1728_s11  }
  0x73   : > { %s1230_s26 = sshll.u32 %s1901_s17, 3  ;;  %s1231_s9 = sshll.u32 %s1723_s21, 7 }
  0x74   : > { %s1947_s16 = scalar_lea.hbm %s2224_s4, %s1231_s9  ;;  %s237_s8 = scalar_lea.vmem [#allocation9], %s1230_s26 }
  0x75   : > { %s244_s0 = sshll.u32 %s237_s8, 4  ;;  %s234_s1 = scalar_lea.sflag [#allocation10], %s1901_s17  ;;  %s245_s0 = int_to_ptr.vmem [resolvable:$true] %s244_s0 }
  0x76   : > { %s1619_s2 = scalar_lea.hbm %s1947_s16, 128  ;;  %s1624_s13 = scalar_lea.hbm %s2224_s4, 256 }
  0x77   : > { %p1620_p6 = scmp.ne.s32.totalorder %s1947_s16, %s1619_s2  ;;  %p1625_p9 = scmp.lt.u32.totalorder %s1947_s16, %s2224_s4 }
  0x78   : > { %p1626_p10 = scmp.lt.u32.totalorder %s1624_s13, %s1619_s2  ;;  %p1628_p4 = scmp.lt.u32.totalorder %s1619_s2, %s1947_s16 }
  0x79   : > { %p1622_p13 = pnand %p1620_p6, %p1591_p3 }
  0x7a   : > { %p1627_p1 = por %p1626_p10, %p1625_p9 }
  0x7b   : > { %p1623_p7 = pneg %p1622_p13 }
  0x7c   : > { %p1629_p0 = por %p1628_p4, %p1627_p1 }
  0x7e   : > { %p1630_p2 = pnand %p1629_p0, %p1623_p7 }
  0x80   : > { %1633 = shalt.err (!%p1630_p2)
}
  0x81   : > { %s1634_s17 = scalar_lea.vmem %s245_s0, 128  ;;  %s1731_s25 = smov [#allocation9]  }
  0x82   : > { %p1635_p5 = scmp.ne.s32.totalorder %s245_s0, %s1634_s17  ;;  %s1639_s26 = sshll.u32 %s1731_s25, 4  ;;  %s1640_s26 = int_to_ptr.vmem [resolvable:$false] %s1639_s26 }
  0x83   : > { %s1641_s9 = scalar_lea.vmem %s1640_s26, 256  ;;  %p1642_p6 = scmp.lt.s32.totalorder %s245_s0, %s1640_s26 }
  0x84   : > { %p1637_p11 = pnand %p1635_p5, %p1591_p3  ;;  %p1643_p13 = scmp.lt.s32.totalorder %s1641_s9, %s1634_s17 }
  0x86   : > { %p1638_p12 = pneg %p1637_p11  ;;  %p1644_p9 = por %p1643_p13, %p1642_p6 }
  0x88   : > { %p1645_p10 = pnand %p1644_p9, %p1638_p12 }
  0x8a   : > { %1648 = shalt.err (!%p1645_p10)
}
  0x8b   : > { %1407 = dma.hbm_to_vmem [thread:$0]  (!%p2247_p8), %s1947_s16, 128, %s245_s0, %s234_s1  }
  0x8c   : > { %p2249_p7 = scmp.ne.s32.totalorder %s2239_s7, 0 }
  0x8d   : > { %s1972_s2 = sand.u32 (!%p2249_p7), 1, %s1715_s19   ;;  %p2250_p3 = scmp.ne.s32.totalorder (!%p2249_p7), %s2236_s29, 0 }
  0x8e   : > { %253 = sbr.rel (%p2249_p7) target bundleno = 5811 (0x16b3), region = 40  ;;  %s1233_s23 = sshll.u32 (!%p2249_p7), %s1972_s2, 5 }
  0x8f   : > { %s256_s28 = scalar_lea.sflag (!%p2249_p7), [#allocation4], %s1972_s2  ;;  %s1976_s8 = scalar_lea.vmem (!%p2249_p7), [#allocation3], %s1233_s23 }
  0x95   : > { %1694 = dma.done.wait (%p2250_p3), %s256_s28, 512  }
  0x96   : > { %1696 = vsyncadd (%p2250_p3), %s256_s28, 4294966784  ;;  %p2251_p8 = scmp.eq.s32.totalorder %s1791_s22, 0 }
  0x98   : > { %1698 = dma.done.wait (%p2251_p8), [#allocation7], 384   ;;  %p2252_p1 = pmov %p2251_p8 }
  0x99   : > { %s1236_s0 = sshll.u32 %s1972_s2, 3  ;;  %s273_s1 = scalar_lea.sflag [#allocation10], %s1972_s2 }
  0x9a   : > { %1700 = vsyncadd (%p2252_p1), [#allocation7], 4294966912  ;;  %s276_s7 = scalar_lea.vmem [#allocation9], %s1236_s0 }
  0x9b   : > { %1702 = dma.done.wait (%p2250_p3), %s273_s1, 128  }
  0x9c   : > { %1704 = vsyncadd (%p2250_p3), %s273_s1, 4294967168  ;;  %v1732_v0 = vmov 0.0   ;;  %vm1733_vm0 = vmmov 0   ;;  %v1462_v1 = vld [vmem:[#allocation6] sm:$0xff]   ;;  %v1995_v2 = vld [vmem:[#allocation8] sm:$0xff]   ;;  %vm352_vm1 = vcmask 130048  }
  0x9d   : > { %1316 = vmatprep.subr.bf16.mxu1 %v1732_v0  ;;  %1320 = vmatprep.mubr.msk.bf16.mxu1 %vm1733_vm0, %v1732_v0  ;;  %v1464_v3 = vld [vmem:[%s1976_s8] sm:$0xff]   ;;  %v1465_v4 = vld [vmem:[%s1976_s8 + $0x8] sm:$0xff]   ;;  %v2002_v5 = vld [vmem:[#allocation8 + $0x8] sm:$0xff]   ;;  %vm457_vm2 = vcmask 261120   ;;  %s1734_s16 = smov 64   ;;  %s1735_s11 = smov 32  }
  0x9e   : > { %1306 = vmatprep.subr.bf16.mxu0 %v1462_v1  ;;  %1317 = vmatpush3.bf16.msra.mxu1 %v1995_v2  ;;  %v442_v6 = vld [vmem:[%s276_s7] sm:$0xff]  ;;  %v1467_v51 = vld [vmem:[%s1976_s8 + $0x10] sm:$0xff]   ;;  %s1237_s10 = sshll.u32 %s1972_s2, 6  ;;  %s1274_s14 = sshll.u32 %s1791_s22, 7 }
  0x9f   : > { %1307 = vmatpush3.bf16.msra.mxu0 %v1462_v1  ;;  %1308 = vmatprep.mubr.msk.bf16.mxu0 %vm352_vm1, %v1464_v3  ;;  %v444_v7 = vpack.c.bf16 %v442_v6, %v442_v6  ;;  %v2022_v8 = vld [vmem:[%s2223_s3] ss:$0 sm:$0xff]  ;;  %v1468_v52 = vld [vmem:[%s1976_s8 + $0x18] sm:$0xff]   ;;  %s307_s13 = scalar_lea.vmem [#allocation11], %s1237_s10  ;;  %s2175_s26 = scalar_lea.hbm %s2225_s5, %s1274_s14 }
  0xa0   : > { %1318 = vmatprep.subr.bf16.mxu1 %v1732_v0  ;;  %1332 = vmatprep.subr.bf16.mxu0 %v1732_v0  ;;  %s1108_s12 = sshll.u32 %s307_s13, 4  ;;  %s1096_s9 = scalar_lea.sflag [#allocation5], %s1972_s2  ;;  %s2170_s12 = int_to_ptr.vmem [resolvable:$true] %s1108_s12 }
  0xa1   : > { %s1649_s23 = scalar_lea.vmem %s2170_s12, 1024  ;;  %p2253_p0 = scmp.ne.s32.totalorder %s2237_s30, 0 }
  0xa2   : > { %1309 = vmatmul.mubr.msk.bf16.vlgmr.msra.gmra.mrb[0].mxu0 %vm352_vm1, %v1465_v4  ;;  %1319 = vmatpush3.bf16.msra.mxu1 %v2002_v5  ;;  %p1650_p4 = scmp.ne.s32.totalorder %s2170_s12, %s1649_s23  ;;  %s1736_s22 = smov [#allocation11]  }
  0xa3   : > { %1333 = vmatpush3.bf16.msra.mxu0 %v1995_v2  ;;  %1324 = vmatprep.subr.bf16.mxu1 %v1732_v0  ;;  %s1653_s28 = sshll.u32 %s1736_s22, 4  ;;  %s1654_s28 = int_to_ptr.vmem [resolvable:$false] %s1653_s28 }
  0xa4   : > { %1334 = vmatprep.subr.bf16.mxu0 %v1732_v0  ;;  %1312 = vmatprep.mubr.msk.bf16.mxu0 %vm352_vm1, %v1467_v51  ;;  %p1651_p2 = pnand %p1650_p4, %p2253_p0  ;;  %s1655_s8 = scalar_lea.vmem %s1654_s28, 2048 }
  0xa5   : > { %1321 = vmatmul.mubr.msk.bf16.vlgmr.msra.gmra.mrb[0].mxu1 %vm457_vm2, %v444_v7  ;;  %p1656_p11 = scmp.lt.s32.totalorder %s2170_s12, %s1654_s28  ;;  %p1657_p12 = scmp.lt.s32.totalorder %s1655_s8, %s1649_s23 }
  0xa6   : > { %1325 = vmatpush3.bf16.msra.mxu1 %v1995_v2  ;;  %1328 = vmatprep.mubr.msk.bf16.mxu1 %vm1733_vm0, %v1732_v0  ;;  %p1652_p5 = pneg %p1651_p2 }
  0xa7   : > { %1326 = vmatprep.subr.bf16.mxu1 %v1732_v0  ;;  %1335 = vmatpush3.bf16.msra.mxu0 %v2002_v5  ;;  %p1658_p6 = por %p1657_p12, %p1656_p11 }
  0xa8   : > { %1348 = vmatprep.subr.bf16.mxu0 %v1732_v0 }
  0xa9   : > { %p1659_p13 = pnand %p1658_p6, %p1652_p5 }
  0xaa   : > { %1327 = vmatpush3.bf16.msra.mxu1 %v2002_v5  ;;  %1313 = vmatmul.mubr.msk.bf16.gmra.mrb[4].mxu0 %vm352_vm1, %v1468_v52 }
  0xab   : > { %1340 = vmatprep.subr.bf16.mxu1 %v1732_v0  ;;  %1336 = vmatprep.mubr.msk.bf16.mxu0 %vm1733_vm0, %v1732_v0 }
 0x175   : > { %v2024_v9 = vpop.f32.mrb[0].mxu0 }
 0x176   : > { %v399_v10 = vpop.f32.mrb[1].mxu0  ;;  %v408_v62 = vadd.f32 %v2024_v9, %v2022_v8 }
 0x177   : > { %v400_v11 = vadd.f32 %v2022_v8, %v399_v10  ;;  %v2027_v12 = vpop.f32.mrb[2].mxu0 }
 0x178   : > { %v402_v13 = vpop.f32.mrb[3].mxu0  ;;  %v495_v14 = vpop.f32.mrb[0].mxu1 }
 0x179   : > { %v501_v15 = vadd.f32 %v495_v14, %v400_v11  ;;  %v1322_v16 = vpop.f32.mrb[1].mxu1  ;;  %v403_v35 = vadd.f32 %v2022_v8, %v402_v13 }
 0x17a   : > { %v498_v17 = vpop.f32.mrb[2].mxu1 }
 0x17b   : > { %1469 = vtanh.f32 %v501_v15  ;;  %v1323_v18 = vpop.f32.mrb[3].mxu1  ;;  %v1251_v20 = vmul.f32 -1.442695, %v501_v15 }
 0x17d   : > { %1471 = vpow2.f32 %v1251_v20  ;;  %v2060_v57 = vpop.f32.mrb[4].mxu0 }
 0x17e   : > { %v2062_v58 = vpop.f32.mrb[5].mxu0 }
 0x17f   : > { %v2064_v59 = vpop.f32.mrb[6].mxu0 }
 0x180   : > { %v2066_v60 = vpop.f32.mrb[7].mxu0 }
 0x185   : > { %v1470_v19 = vpop.eup %1469 }
 0x186   : > { %515 = vrot.lane.b32.xlu0 %v1470_v19, %s1734_s16 }
 0x187   : > { %v1472_v21 = vpop.eup %1471 }
 0x188   : > { %v505_v22 = vadd.f32 1.0, %v1472_v21 }
 0x18a   : > { %510 = vrot.lane.b32.xlu0 %v442_v6, %s1735_s11  ;;  %1473 = vrcp.f32 %v505_v22 }
 0x194   : > { %v1474_v23 = vpop.eup %1473 }
 0x1f8   : > { %v516_v24 = vpop.permute.xlu0 %515 }
 0x1f9   : > { %v518_v25 = vmul.f32 %v1474_v23, %v516_v24  ;;  %v411_v24 = vadd.f32 %v2027_v12, %v2022_v8 }
 0x1fb   : > { %520 = vrot.lane.b32.xlu1 %v518_v25, %s1735_s11 }
 0x1fc   : > { %v511_v26 = vpop.permute.xlu0 %510 }
 0x1fd   : > { %v513_v27 = vmul.f32 %v1474_v23, %v511_v26 }
 0x26d   : > { %v521_v28 = vpop.permute.xlu1 %520 }
 0x26e   : > { %v523_v29 = vadd.f32 %v521_v28, %v513_v27 }
 0x270   : > { %1475 = vtanh.f32 %v523_v29 }
 0x27a   : > { %v1476_v30 = vpop.eup %1475 }
 0x27b   : > { %526 = vrot.lane.b32.xlu1 %v1476_v30, %s1734_s16 }
 0x2ed   : > { %v527_v31 = vpop.permute.xlu1 %526 }
 0x2ee   : > { %v2033_v32 = vmul.f32 %v1474_v23, %v527_v31 }
 0x2f0   : > { %v537_v33 = vpack.c.bf16 %v2033_v32, %v2033_v32 }
 0x2f2   : > { %539 = vrot.lane.b32.xlu0 %v537_v33, %s1735_s11 }
 0x364   : > { %v540_v34 = vpop.permute.xlu0 %539 }
 0x365   : > { %1329 = vmatmul.mubr.msk.bf16.vlgmr.msra.gmra.mrb[4].mxu1 %vm457_vm2, %v540_v34 }
 0x366   : > { %1341 = vmatpush3.bf16.msra.mxu1 %v1995_v2  ;;  %1344 = vmatprep.mubr.msk.bf16.mxu1 %vm1733_vm0, %v1732_v0 }
 0x367   : > { %1342 = vmatprep.subr.bf16.mxu1 %v1732_v0 }
 0x36a   : > { %1343 = vmatpush3.bf16.msra.mxu1 %v2002_v5 }
 0x36b   : > { %1356 = vmatprep.subr.bf16.mxu1 %v1732_v0 }
 0x438   : > { %v578_v36 = vpop.f32.mrb[4].mxu1 }
 0x439   : > { %v584_v37 = vadd.f32 %v578_v36, %v403_v35  ;;  %v1330_v38 = vpop.f32.mrb[5].mxu1 }
 0x43a   : > { %v581_v39 = vpop.f32.mrb[6].mxu1 }
 0x43b   : > { %1477 = vtanh.f32 %v584_v37  ;;  %v1331_v40 = vpop.f32.mrb[7].mxu1  ;;  %v1253_v42 = vmul.f32 -1.442695, %v584_v37 }
 0x43d   : > { %1479 = vpow2.f32 %v1253_v42 }
 0x445   : > { %v1478_v41 = vpop.eup %1477 }
 0x446   : > { %594 = vrot.lane.b32.xlu1 %v1478_v41, %s1734_s16 }
 0x447   : > { %v1480_v43 = vpop.eup %1479 }
 0x448   : > { %v588_v44 = vadd.f32 1.0, %v1480_v43 }
 0x44a   : > { %1481 = vrcp.f32 %v588_v44 }
 0x454   : > { %v1482_v45 = vpop.eup %1481 }
 0x455   : > { %v592_v48 = vmul.f32 %v1482_v45, %v523_v29 }
 0x4b8   : > { %v595_v46 = vpop.permute.xlu1 %594 }
 0x4b9   : > { %v597_v47 = vmul.f32 %v1482_v45, %v595_v46 }
 0x4bb   : > { %599 = vrot.lane.b32.xlu0 %v597_v47, %s1735_s11 }
 0x52d   : > { %v600_v49 = vpop.permute.xlu0 %599 }
 0x52e   : > { %v602_v50 = vadd.f32 %v600_v49, %v592_v48 }
 0x530   : > { %1483 = vtanh.f32 %v602_v50 }
 0x53a   : > { %v1484_v53 = vpop.eup %1483 }
 0x53b   : > { %605 = vrot.lane.b32.xlu1 %v1484_v53, %s1734_s16 }
 0x5ad   : > { %v606_v54 = vpop.permute.xlu1 %605 }
 0x5ae   : > { %v2055_v55 = vmul.f32 %v1482_v45, %v606_v54  ;;  %v416_v45 = vadd.f32 %v2022_v8, %v2062_v58 }
 0x5b0   : > { %v617_v56 = vpack.c.bf16 %v2055_v55, %v2055_v55 }
 0x5b2   : > { %619 = vrot.lane.b32.xlu0 %v617_v56, %s1735_s11 }
 0x624   : > { %v620_v61 = vpop.permute.xlu0 %619 }
 0x625   : > { %1337 = vmatmul.mubr.msk.bf16.vlgmr.msra.gmra.mrb[8].mxu0 %vm457_vm2, %v620_v61 }
 0x626   : > { %1349 = vmatpush3.bf16.msra.mxu0 %v1995_v2  ;;  %1352 = vmatprep.mubr.msk.bf16.mxu0 %vm1733_vm0, %v1732_v0 }
 0x627   : > { %1350 = vmatprep.subr.bf16.mxu0 %v1732_v0 }
 0x62a   : > { %1351 = vmatpush3.bf16.msra.mxu0 %v2002_v5 }
 0x62b   : > { %1364 = vmatprep.subr.bf16.mxu0 %v1732_v0 }
 0x6f8   : > { %v658_v63 = vpop.f32.mrb[8].mxu0 }
 0x6f9   : > { %v664_v1 = vadd.f32 %v658_v63, %v408_v62  ;;  %v1338_v3 = vpop.f32.mrb[9].mxu0 }
 0x6fa   : > { %v661_v4 = vpop.f32.mrb[10].mxu0 }
 0x6fb   : > { %1485 = vtanh.f32 %v664_v1  ;;  %v1339_v6 = vpop.f32.mrb[11].mxu0  ;;  %v1256_v10 = vmul.f32 -1.442695, %v664_v1 }
 0x6fd   : > { %1487 = vpow2.f32 %v1256_v10 }
 0x705   : > { %v1486_v7 = vpop.eup %1485 }
 0x706   : > { %674 = vrot.lane.b32.xlu1 %v1486_v7, %s1734_s16 }
 0x707   : > { %v1488_v11 = vpop.eup %1487 }
 0x708   : > { %v668_v13 = vadd.f32 1.0, %v1488_v11  ;;  %v419_v11 = vadd.f32 %v2022_v8, %v2066_v60 }
 0x70a   : > { %1489 = vrcp.f32 %v668_v13 }
 0x714   : > { %v1490_v14 = vpop.eup %1489 }
 0x715   : > { %v672_v9 = vmul.f32 %v1490_v14, %v602_v50 }
 0x778   : > { %v675_v15 = vpop.permute.xlu1 %674 }
 0x779   : > { %v677_v16 = vmul.f32 %v1490_v14, %v675_v15 }
 0x77b   : > { %679 = vrot.lane.b32.xlu0 %v677_v16, %s1735_s11 }
 0x7ed   : > { %v680_v17 = vpop.permute.xlu0 %679 }
 0x7ee   : > { %v682_v18 = vadd.f32 %v680_v17, %v672_v9 }
 0x7f0   : > { %1491 = vtanh.f32 %v682_v18 }
 0x7fa   : > { %v1492_v19 = vpop.eup %1491 }
 0x7fb   : > { %685 = vrot.lane.b32.xlu1 %v1492_v19, %s1734_s16 }
 0x86d   : > { %v686_v20 = vpop.permute.xlu1 %685 }
 0x86e   : > { %v2080_v21 = vmul.f32 %v1490_v14, %v686_v20 }
 0x870   : > { %v697_v22 = vpack.c.bf16 %v2080_v21, %v2080_v21 }
 0x872   : > { %699 = vrot.lane.b32.xlu0 %v697_v22, %s1735_s11 }
 0x8e4   : > { %v700_v23 = vpop.permute.xlu0 %699 }
 0x8e5   : > { %1345 = vmatmul.mubr.msk.bf16.vlgmr.msra.gmra.mrb[8].mxu1 %vm457_vm2, %v700_v23 }
 0x8e6   : > { %1357 = vmatpush3.bf16.msra.mxu1 %v1995_v2  ;;  %1360 = vmatprep.mubr.msk.bf16.mxu1 %vm1733_vm0, %v1732_v0 }
 0x8e7   : > { %1358 = vmatprep.subr.bf16.mxu1 %v1732_v0 }
 0x8ea   : > { %1359 = vmatpush3.bf16.msra.mxu1 %v2002_v5 }
 0x8eb   : > { %1372 = vmatprep.subr.bf16.mxu1 %v1732_v0 }
 0x9b8   : > { %v738_v25 = vpop.f32.mrb[8].mxu1 }
 0x9b9   : > { %v744_v26 = vadd.f32 %v738_v25, %v411_v24  ;;  %v1346_v27 = vpop.f32.mrb[9].mxu1 }
 0x9ba   : > { %v741_v28 = vpop.f32.mrb[10].mxu1 }
 0x9bb   : > { %1493 = vtanh.f32 %v744_v26  ;;  %v1347_v29 = vpop.f32.mrb[11].mxu1  ;;  %v1259_v31 = vmul.f32 -1.442695, %v744_v26 }
 0x9bc   : > { %v424_v29 = vadd.f32 %v2060_v57, %v2022_v8 }
 0x9bd   : > { %1495 = vpow2.f32 %v1259_v31 }
 0x9c5   : > { %v1494_v30 = vpop.eup %1493 }
 0x9c6   : > { %754 = vrot.lane.b32.xlu1 %v1494_v30, %s1734_s16 }
 0x9c7   : > { %v1496_v33 = vpop.eup %1495 }
 0x9c8   : > { %v748_v34 = vadd.f32 1.0, %v1496_v33 }
 0x9ca   : > { %1497 = vrcp.f32 %v748_v34 }
 0x9d4   : > { %v1498_v35 = vpop.eup %1497 }
 0x9d5   : > { %v752_v12 = vmul.f32 %v1498_v35, %v682_v18 }
 0xa38   : > { %v755_v36 = vpop.permute.xlu1 %754 }
 0xa39   : > { %v757_v37 = vmul.f32 %v1498_v35, %v755_v36 }
 0xa3b   : > { %759 = vrot.lane.b32.xlu0 %v757_v37, %s1735_s11 }
 0xaad   : > { %v760_v38 = vpop.permute.xlu0 %759 }
 0xaae   : > { %v762_v39 = vadd.f32 %v760_v38, %v752_v12 }
 0xab0   : > { %1499 = vtanh.f32 %v762_v39 }
 0xaba   : > { %v1500_v40 = vpop.eup %1499 }
 0xabb   : > { %765 = vrot.lane.b32.xlu1 %v1500_v40, %s1734_s16 }
 0xb2d   : > { %v766_v41 = vpop.permute.xlu1 %765 }
 0xb2e   : > { %v2097_v42 = vmul.f32 %v1498_v35, %v766_v41 }
 0xb30   : > { %v777_v43 = vpack.c.bf16 %v2097_v42, %v2097_v42 }
 0xb32   : > { %779 = vrot.lane.b32.xlu0 %v777_v43, %s1735_s11 }
 0xba4   : > { %v780_v44 = vpop.permute.xlu0 %779 }
 0xba5   : > { %1353 = vmatmul.mubr.msk.bf16.vlgmr.msra.gmra.mrb[12].mxu0 %vm457_vm2, %v780_v44 }
 0xba6   : > { %1365 = vmatpush3.bf16.msra.mxu0 %v1995_v2  ;;  %1368 = vmatprep.mubr.msk.bf16.mxu0 %vm1733_vm0, %v1732_v0 }
 0xba7   : > { %1366 = vmatprep.subr.bf16.mxu0 %v1732_v0 }
 0xbaa   : > { %1367 = vmatpush3.bf16.msra.mxu0 %v2002_v5 }
 0xc78   : > { %v818_v46 = vpop.f32.mrb[12].mxu0 }
 0xc79   : > { %v824_v47 = vadd.f32 %v818_v46, %v416_v45  ;;  %v1354_v48 = vpop.f32.mrb[13].mxu0 }
 0xc7a   : > { %v821_v49 = vpop.f32.mrb[14].mxu0 }
 0xc7b   : > { %1501 = vtanh.f32 %v824_v47  ;;  %v1355_v50 = vpop.f32.mrb[15].mxu0  ;;  %v1262_v52 = vmul.f32 -1.442695, %v824_v47 }
 0xc7c   : > { %v427_v50 = vadd.f32 %v2064_v59, %v2022_v8 }
 0xc7d   : > { %1503 = vpow2.f32 %v1262_v52 }
 0xc85   : > { %v1502_v51 = vpop.eup %1501 }
 0xc86   : > { %834 = vrot.lane.b32.xlu1 %v1502_v51, %s1734_s16 }
 0xc87   : > { %v1504_v53 = vpop.eup %1503 }
 0xc88   : > { %v828_v54 = vadd.f32 1.0, %v1504_v53 }
 0xc8a   : > { %1505 = vrcp.f32 %v828_v54 }
 0xc94   : > { %v1506_v56 = vpop.eup %1505 }
 0xc95   : > { %v832_v58 = vmul.f32 %v1506_v56, %v762_v39 }
 0xcf8   : > { %v835_v61 = vpop.permute.xlu1 %834 }
 0xcf9   : > { %v837_v62 = vmul.f32 %v1506_v56, %v835_v61 }
 0xcfb   : > { %839 = vrot.lane.b32.xlu0 %v837_v62, %s1735_s11 }
 0xd6d   : > { %v840_v63 = vpop.permute.xlu0 %839 }
 0xd6e   : > { %v842_v1 = vadd.f32 %v840_v63, %v832_v58 }
 0xd70   : > { %1507 = vtanh.f32 %v842_v1 }
 0xd7a   : > { %v1508_v3 = vpop.eup %1507 }
 0xd7b   : > { %845 = vrot.lane.b32.xlu1 %v1508_v3, %s1734_s16 }
 0xded   : > { %v846_v4 = vpop.permute.xlu1 %845 }
 0xdee   : > { %v2113_v6 = vmul.f32 %v1506_v56, %v846_v4 }
 0xdf0   : > { %v857_v7 = vpack.c.bf16 %v2113_v6, %v2113_v6 }
 0xdf2   : > { %859 = vrot.lane.b32.xlu0 %v857_v7, %s1735_s11 }
 0xe64   : > { %v860_v10 = vpop.permute.xlu0 %859 }
 0xe65   : > { %1361 = vmatmul.mubr.msk.bf16.vlgmr.msra.gmra.mrb[12].mxu1 %vm457_vm2, %v860_v10 }
 0xe66   : > { %1373 = vmatpush3.bf16.msra.mxu1 %v1995_v2  ;;  %1376 = vmatprep.mubr.msk.bf16.mxu1 %vm1733_vm0, %v1732_v0 }
 0xe67   : > { %1374 = vmatprep.subr.bf16.mxu1 %v1732_v0 }
 0xe6a   : > { %1375 = vmatpush3.bf16.msra.mxu1 %v2002_v5 }
 0xf38   : > { %v898_v13 = vpop.f32.mrb[12].mxu1 }
 0xf39   : > { %v904_v14 = vadd.f32 %v898_v13, %v419_v11  ;;  %v1362_v15 = vpop.f32.mrb[13].mxu1 }
 0xf3a   : > { %v901_v16 = vpop.f32.mrb[14].mxu1 }
 0xf3b   : > { %1509 = vtanh.f32 %v904_v14  ;;  %v1363_v9 = vpop.f32.mrb[15].mxu1  ;;  %v1265_v2 = vmul.f32 -1.442695, %v904_v14 }
 0xf3d   : > { %1511 = vpow2.f32 %v1265_v2 }
 0xf45   : > { %v1510_v17 = vpop.eup %1509 }
 0xf46   : > { %914 = vrot.lane.b32.xlu1 %v1510_v17, %s1734_s16 }
 0xf47   : > { %v1512_v18 = vpop.eup %1511 }
 0xf48   : > { %v908_v19 = vadd.f32 1.0, %v1512_v18 }
 0xf4a   : > { %1513 = vrcp.f32 %v908_v19 }
 0xf54   : > { %v1514_v0 = vpop.eup %1513 }
 0xf55   : > { %v912_v60 = vmul.f32 %v1514_v0, %v842_v1 }
 0xfb8   : > { %v915_v20 = vpop.permute.xlu1 %914 }
 0xfb9   : > { %v917_v5 = vmul.f32 %v1514_v0, %v915_v20 }
 0xfbb   : > { %919 = vrot.lane.b32.xlu0 %v917_v5, %s1735_s11 }
0x102d   : > { %v920_v22 = vpop.permute.xlu0 %919 }
0x102e   : > { %v922_v23 = vadd.f32 %v920_v22, %v912_v60 }
0x1030   : > { %1515 = vtanh.f32 %v922_v23 }
0x103a   : > { %v1516_v24 = vpop.eup %1515 }
0x103b   : > { %925 = vrot.lane.b32.xlu1 %v1516_v24, %s1734_s16 }
0x10ad   : > { %v926_v25 = vpop.permute.xlu1 %925 }
0x10ae   : > { %v2129_v26 = vmul.f32 %v1514_v0, %v926_v25 }
0x10b0   : > { %v937_v27 = vpack.c.bf16 %v2129_v26, %v2129_v26 }
0x10b2   : > { %939 = vrot.lane.b32.xlu0 %v937_v27, %s1735_s11 }
0x1124   : > { %v940_v28 = vpop.permute.xlu0 %939 }
0x1125   : > { %1369 = vmatmul.mubr.msk.bf16.vlgmr.msra.gmra.mrb[16].mxu0 %vm457_vm2, %v940_v28 }
0x11f8   : > { %v978_v30 = vpop.f32.mrb[16].mxu0 }
0x11f9   : > { %v984_v31 = vadd.f32 %v978_v30, %v424_v29  ;;  %v1370_v33 = vpop.f32.mrb[17].mxu0 }
0x11fa   : > { %v981_v34 = vpop.f32.mrb[18].mxu0 }
0x11fb   : > { %1517 = vtanh.f32 %v984_v31  ;;  %v1371_v35 = vpop.f32.mrb[19].mxu0  ;;  %v1268_v37 = vmul.f32 -1.442695, %v984_v31 }
0x11fd   : > { %1519 = vpow2.f32 %v1268_v37 }
0x1205   : > { %v1518_v36 = vpop.eup %1517 }
0x1206   : > { %994 = vrot.lane.b32.xlu1 %v1518_v36, %s1734_s16 }
0x1207   : > { %v1520_v12 = vpop.eup %1519 }
0x1208   : > { %v988_v38 = vadd.f32 1.0, %v1520_v12 }
0x120a   : > { %1521 = vrcp.f32 %v988_v38 }
0x1214   : > { %v1522_v39 = vpop.eup %1521 }
0x1215   : > { %v992_v57 = vmul.f32 %v1522_v39, %v922_v23 }
0x1278   : > { %v995_v40 = vpop.permute.xlu1 %994 }
0x1279   : > { %v997_v41 = vmul.f32 %v1522_v39, %v995_v40 }
0x127b   : > { %999 = vrot.lane.b32.xlu0 %v997_v41, %s1735_s11 }
0x12ed   : > { %v1000_v43 = vpop.permute.xlu0 %999 }
0x12ee   : > { %v1002_v44 = vadd.f32 %v1000_v43, %v992_v57 }
0x12f0   : > { %1523 = vtanh.f32 %v1002_v44 }
0x12fa   : > { %v1524_v45 = vpop.eup %1523 }
0x12fb   : > { %1005 = vrot.lane.b32.xlu1 %v1524_v45, %s1734_s16 }
0x136d   : > { %v1006_v46 = vpop.permute.xlu1 %1005 }
0x136e   : > { %v1008_v47 = vmul.f32 %v1522_v39, %v1006_v46 }
0x1370   : > { %v1017_v48 = vpack.c.bf16 %v1008_v47, %v1008_v47 }
0x1372   : > { %1019 = vrot.lane.b32.xlu0 %v1017_v48, %s1735_s11 }
0x13e4   : > { %v1020_v49 = vpop.permute.xlu0 %1019 }
0x13e5   : > { %1377 = vmatmul.mubr.msk.bf16.vlgmr.msra.gmra.mrb[16].mxu1 %vm457_vm2, %v1020_v49 }
0x14b8   : > { %v1058_v51 = vpop.f32.mrb[16].mxu1 }
0x14b9   : > { %v1064_v52 = vadd.f32 %v1058_v51, %v427_v50  ;;  %v1378_v53 = vpop.f32.mrb[17].mxu1 }
0x14ba   : > { %v1061_v54 = vpop.f32.mrb[18].mxu1 }
0x14bb   : > { %1525 = vtanh.f32 %v1064_v52  ;;  %v1379_v56 = vpop.f32.mrb[19].mxu1  ;;  %v1271_v62 = vmul.f32 -1.442695, %v1064_v52 }
0x14bd   : > { %1527 = vpow2.f32 %v1271_v62 }
0x14c5   : > { %v1526_v61 = vpop.eup %1525 }
0x14c6   : > { %1074 = vrot.lane.b32.xlu1 %v1526_v61, %s1734_s16 }
0x14c7   : > { %v1528_v58 = vpop.eup %1527 }
0x14c8   : > { %v1068_v63 = vadd.f32 1.0, %v1528_v58 }
0x14ca   : > { %1529 = vrcp.f32 %v1068_v63 }
0x14d4   : > { %v1530_v1 = vpop.eup %1529 }
0x14d5   : > { %v1072_v8 = vmul.f32 %v1530_v1, %v1002_v44 }
0x1538   : > { %v1075_v3 = vpop.permute.xlu1 %1074 }
0x1539   : > { %v1077_v4 = vmul.f32 %v1530_v1, %v1075_v3 }
0x153b   : > { %1079 = vrot.lane.b32.xlu0 %v1077_v4, %s1735_s11 }
0x153f   : > { %531 = vrot.lane.b32.xlu0 %v2033_v32, %s1735_s11 }
0x1543   : > { %690 = vrot.lane.b32.xlu0 %v2080_v21, %s1735_s11 }
0x1547   : > { %850 = vrot.lane.b32.xlu0 %v2113_v6, %s1735_s11 }
0x154b   : > { %1010 = vrot.lane.b32.xlu0 %v1008_v47, %s1735_s11 }
0x15ad   : > { %v1080_v59 = vpop.permute.xlu0 %1079 }
0x15ae   : > { %v1082_v7 = vadd.f32 %v1080_v59, %v1072_v8 }
0x15b0   : > { %1531 = vtanh.f32 %v1082_v7 }
0x15b1   : > { %v532_v10 = vpop.permute.xlu0 %531 }
0x15b2   : > { %534 = vst.msk [vmem:[%s307_s13] sm:$0xff] %vm457_vm2, %v532_v10 }
0x15b5   : > { %v691_v11 = vpop.permute.xlu0 %690 }
0x15b6   : > { %1257 = vst.msk [vmem:[%s307_s13 + $0x10] sm:$0xff] %vm457_vm2, %v691_v11 }
0x15b9   : > { %v851_v32 = vpop.permute.xlu0 %850 }
0x15ba   : > { %v1532_v13 = vpop.eup %1531  ;;  %1263 = vst.msk [vmem:[%s307_s13 + $0x20] sm:$0xff] %vm457_vm2, %v851_v32 }
0x15bb   : > { %1085 = vrot.lane.b32.xlu1 %v1532_v13, %s1734_s16 }
0x15bd   : > { %v1011_v21 = vpop.permute.xlu0 %1010 }
0x15be   : > { %1269 = vst.msk [vmem:[%s307_s13 + $0x30] sm:$0xff] %vm457_vm2, %v1011_v21 }
0x15bf   : > { %610 = vrot.lane.b32.xlu1 %v2055_v55, %s1735_s11 }
0x15c3   : > { %770 = vrot.lane.b32.xlu1 %v2097_v42, %s1735_s11 }
0x15c7   : > { %930 = vrot.lane.b32.xlu1 %v2129_v26, %s1735_s11 }
0x162d   : > { %v1086_v6 = vpop.permute.xlu1 %1085 }
0x162e   : > { %v1088_v14 = vmul.f32 %v1530_v1, %v1086_v6 }
0x1630   : > { %1090 = vrot.lane.b32.xlu1 %v1088_v14, %s1735_s11 }
0x1631   : > { %v611_v15 = vpop.permute.xlu1 %610 }
0x1632   : > { %1254 = vst.msk [vmem:[%s307_s13 + $0x8] sm:$0xff] %vm457_vm2, %v611_v15 }
0x1635   : > { %v771_v16 = vpop.permute.xlu1 %770 }
0x1636   : > { %1260 = vst.msk [vmem:[%s307_s13 + $0x18] sm:$0xff] %vm457_vm2, %v771_v16 }
0x1639   : > { %v931_v9 = vpop.permute.xlu1 %930 }
0x163a   : > { %1266 = vst.msk [vmem:[%s307_s13 + $0x28] sm:$0xff] %vm457_vm2, %v931_v9 }
0x16a2   : > { %v1091_v55 = vpop.permute.xlu1 %1090 }
0x16a3   : > { %1272 = vst.msk [vmem:[%s307_s13 + $0x38] sm:$0xff] %vm457_vm2, %v1091_v55 }
0x16a4   : > { %1662 = shalt.err (!%p1659_p13)
}
0x16a5   : > { %s1663_s0 = scalar_lea.hbm %s2175_s26, 1024  ;;  %s1667_s29 = scalar_lea.hbm %s2225_s5, 2048 }
0x16a6   : > { %p1664_p9 = scmp.ne.s32.totalorder %s2175_s26, %s1663_s0  ;;  %p1668_p3 = scmp.lt.u32.totalorder %s2175_s26, %s2225_s5 }
0x16a7   : > { %p1669_p8 = scmp.lt.u32.totalorder %s1667_s29, %s1663_s0  ;;  %p1671_p4 = scmp.lt.u32.totalorder %s1663_s0, %s2175_s26 }
0x16a8   : > { %p1665_p10 = pnand %p1664_p9, %p2253_p0 }
0x16a9   : > { %p1670_p1 = por %p1669_p8, %p1668_p3 }
0x16aa   : > { %p1666_p7 = pneg %p1665_p10 }
0x16ab   : > { %p1672_p2 = por %p1671_p4, %p1670_p1 }
0x16ad   : > { %p1673_p5 = pnand %p1672_p2, %p1666_p7 }
0x16af   : > { %1676 = shalt.err (!%p1673_p5)
}
0x16b0   : > { %s1737_s11 = smov 128   ;;  %s1738_s10 = smov 256  }
0x16b1   : > { %s1739_s13 = smov 8  }
0x16b2   : > { %1392 = dma.vmem_to_hbm [thread:$0]  (%p2253_p0), %s2170_s12, 1024, %s2175_s26, %s1096_s9, %s1737_s11, %s1738_s10, %s1739_s13  }
0x16b3 PF: > { %s1123_s14 = sand.u32 1, %s1711_s18   ;;  %p2254_p11 = scmp.ne.s32.totalorder %s2238_s6, 0 }
0x16b4   : > { %p2255_p12 = scmp.ge.s32.totalorder %s1723_s21, 2  ;;  %s1124_s17 = scalar_lea.sflag [#allocation5], %s1123_s14 }
0x16b6   : > { %p1409_p6 = pnand %p2255_p12, %p2254_p11 }
0x16b8   : > { %1706 = dma.done.wait (!%p1409_p6), %s1124_s17, 1024  }
0x16b9   : > { %1708 = vsyncadd (!%p1409_p6), %s1124_s17, 4294966272  ;;  %p22_p13 = scmp.ge.s32.totalorder %s1795_s24, 4   ;;  %s2256_s18 = smov %s1715_s19 }
0x16ba   : > { %s2257_s19 = smov %s1719_s20  ;;  %s2258_s20 = smov %s1807_s27 }
0x16bb   : > { %s2259_s21 = smov %s1795_s24  ;;  %24 = sbr.rel (!%p22_p13) target bundleno = 12 (0xc), region = 120 }
0x16c2   :  { %1129 = vsyncpa [#allocation4], 1 }
0x16c3   :  { %1131 = vsyncpa [#allocation4 + $0x1], 1 }
0x16c4   :  { %1132 = vsyncpa [#allocation7], 1 }
0x16c5   :  { %1133 = vsyncpa [#allocation10], 1 }
0x16c6   :  { %1135 = vsyncpa [#allocation10 + $0x1], 1 }
0x16c7   :  { %1136 = vsyncpa [#allocation5], 1 }
0x16c8   :  { %1138 = vsyncpa [#allocation5 + $0x1], 1 }

</bundles_post_ra>
